<compile_context>
chip_gen: v7x
topology: tpu7x:2x2x1
jax: 0.10.0
libtpu: 0.0.40
codegen_flags: <defaults>
</compile_context>

<pallas_src>
import functools

import jax
import jax.numpy as jnp
from jax import lax
from jax.experimental import pallas as pl
from jax.experimental.pallas import tpu as pltpu


# ---------------------------------------------------------------------------
# Pass 1: fused convs + per-tile BatchNorm partial statistics.
# ---------------------------------------------------------------------------
def _conv_stats_kernel(xpar_ref, w1_ref, b1_ref, w2_ref,
                       y2_ref, stats_ref, h1pad_ref, *,
                       H2, W2, Cin, Cmid, neg_slope):
    Cout = 2 * Cmid
    Mimg = H2 * W2

    # ---- conv1 (3x3, stride 2).  The wrapper pre-split the zero-padded
    #      input into its 4 (row, col)-parity planes, so every stride-2 tap
    #      is a unit-stride slice here.  All 9 taps are fused into a single
    #      matmul with K = 9*Cin (bf16 operands, f32 accumulation). ----------
    planes = [xpar_ref[k].astype(jnp.float32) for k in range(4)]
    cols1 = []
    for di in range(3):
        for dj in range(3):
            p = planes[2 * (di % 2) + (dj % 2)]
            r0, c0 = di // 2, dj // 2
            cols1.append(p[r0:r0 + H2, c0:c0 + W2, :])
    patch1 = jnp.concatenate(cols1, axis=-1).reshape(Mimg, 9 * Cin)
    h1 = jnp.dot(patch1.astype(jnp.bfloat16), w1_ref[...],
                 preferred_element_type=jnp.float32) + b1_ref[...]
    h1 = jnp.where(h1 >= 0.0, h1, neg_slope * h1)          # LeakyReLU, f32

    # ---- conv2 (3x3, stride 1, no bias).  Write h1 into a padded VMEM
    #      scratch, zeroing ONLY the one-pixel halo, then fuse the 9 taps
    #      into one matmul with K = 9*Cmid. --------------------------------
    h1pad_ref[0:1, :, :] = jnp.zeros((1, W2 + 2, Cmid), jnp.float32)
    h1pad_ref[H2 + 1:H2 + 2, :, :] = jnp.zeros((1, W2 + 2, Cmid), jnp.float32)
    h1pad_ref[:, 0:1, :] = jnp.zeros((H2 + 2, 1, Cmid), jnp.float32)
    h1pad_ref[:, W2 + 1:W2 + 2, :] = jnp.zeros((H2 + 2, 1, Cmid), jnp.float32)
    h1pad_ref[1:H2 + 1, 1:W2 + 1, :] = h1.reshape(H2, W2, Cmid)

    cols2 = [h1pad_ref[di:di + H2, dj:dj + W2, :]
             for di in range(3) for dj in range(3)]
    patch2 = jnp.concatenate(cols2, axis=-1).reshape(Mimg, 9 * Cmid)
    y2 = jnp.dot(patch2.astype(jnp.bfloat16), w2_ref[...],
                 preferred_element_type=jnp.float32)        # (Mimg, Cout) f32

    # ---- single-pass BatchNorm partial statistics for this tile (f32) -----
    stats_ref[0, 0:1, :] = jnp.sum(y2, axis=0, keepdims=True)
    stats_ref[0, 1:2, :] = jnp.sum(y2 * y2, axis=0, keepdims=True)

    # ---- pre-BN activations out (f32 accumulator precision) ---------------
    y2_ref[...] = y2[None, :, :]


# ---------------------------------------------------------------------------
# Pass 2: BatchNorm normalize (folded into scale/shift) + LeakyReLU.
# Operates on lane-dense (H2, W2*Cout) slabs; purely element-wise.
# ---------------------------------------------------------------------------
def _bn_leaky_kernel(y_ref, scale_ref, shift_ref, o_ref, *, neg_slope):
    scale = scale_ref[...].reshape(1, 1, scale_ref.shape[-1])
    shift = shift_ref[...].reshape(1, 1, shift_ref.shape[-1])
    y = y_ref[...] * scale + shift
    o_ref[...] = jnp.where(y >= 0.0, y, neg_slope * y)


def discriminator_layer(x_nchw, params, *, eps=1e-5, neg_slope=0.2):
    """params = (w1 OIHW, b1, w2 OIHW, bn_gamma, bn_beta); x is NCHW."""
    w1_oihw, b1, w2_oihw, gamma, beta = params
    N, Cin, H, W = x_nchw.shape
    Cmid = w1_oihw.shape[0]
    Cout = 2 * Cmid
    assert H % 2 == 0 and W % 2 == 0, "even spatial dims expected"
    H2, W2 = H // 2, W // 2
    Mimg = H2 * W2
    M = N * Mimg

    # --- cheap 1x input repack (replaces the old 9x im2col in HBM):
    #     NCHW -> NHWC, zero pad, split into the 4 stride-2 parity planes. ---
    x = jnp.transpose(x_nchw, (0, 2, 3, 1)).astype(jnp.float32)
    xp = jnp.pad(x, ((0, 0), (1, 1), (1, 1), (0, 0)))
    planes = [xp[:, p::2, q::2, :] for p in (0, 1) for q in (0, 1)]
    xpar = jnp.stack(planes, axis=1).reshape(N * 4, H2 + 1, W2 + 1, Cin)
    xpar = xpar.astype(jnp.bfloat16)

    # --- weights: OIHW -> HWIO flattened (matches in-kernel tap order);
    #     bf16 MXU operands, f32 bias/BN params. ---------------------------
    w1_flat = jnp.transpose(w1_oihw, (2, 3, 1, 0)).reshape(9 * Cin, Cmid)
    w1_flat = w1_flat.astype(jnp.bfloat16)
    w2_flat = jnp.transpose(w2_oihw, (2, 3, 1, 0)).reshape(9 * Cmid, Cout)
    w2_flat = w2_flat.astype(jnp.bfloat16)
    b1_2d = b1.reshape(1, Cmid).astype(jnp.float32)

    kernel1 = functools.partial(_conv_stats_kernel, H2=H2, W2=W2, Cin=Cin,
                                Cmid=Cmid, neg_slope=neg_slope)
    flops1 = 2 * M * (9 * Cin) * Cmid + 2 * M * (9 * Cmid) * Cout
    bytes1 = (xpar.size * 2 + w1_flat.size * 2 + w2_flat.size * 2 +
              b1_2d.size * 4 + M * Cout * 4 + N * 2 * Cout * 4)

    y2, stats = pl.pallas_call(
        kernel1,
        out_shape=(jax.ShapeDtypeStruct((N, Mimg, Cout), jnp.float32),
                   jax.ShapeDtypeStruct((N, 2, Cout), jnp.float32)),
        grid=(N,),
        in_specs=[
            pl.BlockSpec((4, H2 + 1, W2 + 1, Cin), lambda i: (i, 0, 0, 0)),
            pl.BlockSpec((9 * Cin, Cmid), lambda i: (0, 0)),
            pl.BlockSpec((1, Cmid), lambda i: (0, 0)),
            pl.BlockSpec((9 * Cmid, Cout), lambda i: (0, 0)),
        ],
        out_specs=(
            pl.BlockSpec((1, Mimg, Cout), lambda i: (i, 0, 0)),
            pl.BlockSpec((1, 2, Cout), lambda i: (i, 0, 0)),
        ),
        scratch_shapes=[pltpu.VMEM((H2 + 2, W2 + 2, Cmid), jnp.float32)],
        compiler_params=pltpu.CompilerParams(
            dimension_semantics=("parallel",),
            vmem_limit_bytes=48 * 1024 * 1024),
        cost_estimate=pl.CostEstimate(flops=flops1, transcendentals=0,
                                      bytes_accessed=bytes1),
    )(xpar, w1_flat, b1_2d, w2_flat)

    # --- tiny cross-tile reduction + BN affine folding (f32, O(Cout)) ------
    sums = jnp.sum(stats[:, 0, :], axis=0)
    sqs = jnp.sum(stats[:, 1, :], axis=0)
    mean = sums / M
    var = jnp.maximum(sqs / M - mean * mean, 0.0)          # biased variance
    inv = 1.0 / jnp.sqrt(var + eps)
    scale = gamma.astype(jnp.float32) * inv
    shift = beta.astype(jnp.float32) - mean * scale
    # Tile per-channel affine to the lane-dense (W2*Cout) layout so pass 2
    # needs no in-kernel relayout.
    scale_t = jnp.tile(scale, (W2,)).reshape(1, W2 * Cout)
    shift_t = jnp.tile(shift, (W2,)).reshape(1, W2 * Cout)

    # Pure row-major reshape (no data reordering): (N, H2*W2, Cout) ->
    # lane-dense (N, H2, W2*Cout) slabs for the normalization pass.
    y2_slab = y2.reshape(N, H2, W2 * Cout)

    kernel2 = functools.partial(_bn_leaky_kernel, neg_slope=neg_slope)
    bytes2 = 2 * M * Cout * 4 + 2 * W2 * Cout * 4
    y = pl.pallas_call(
        kernel2,
        out_shape=jax.ShapeDtypeStruct((N, H2, W2 * Cout), jnp.float32),
        grid=(N,),
        in_specs=[
            pl.BlockSpec((1, H2, W2 * Cout), lambda i: (i, 0, 0)),
            pl.BlockSpec((1, W2 * Cout), lambda i: (0, 0)),
            pl.BlockSpec((1, W2 * Cout), lambda i: (0, 0)),
        ],
        out_specs=pl.BlockSpec((1, H2, W2 * Cout), lambda i: (i, 0, 0)),
        compiler_params=pltpu.CompilerParams(
            dimension_semantics=("parallel",),
            vmem_limit_bytes=48 * 1024 * 1024),
        cost_estimate=pl.CostEstimate(flops=3 * M * Cout, transcendentals=0,
                                      bytes_accessed=bytes2),
    )(y2_slab, scale_t, shift_t)

    # NHWC -> NCHW (PyTorch-compatible interface).
    return jnp.transpose(y.reshape(N, H2, W2, Cout), (0, 3, 1, 2))


def reference(x_nchw, params, *, eps=1e-5, neg_slope=0.2):
    """Plain-JAX reference matching the PyTorch forward (train-mode BN)."""
    w1, b1, w2, gamma, beta = params
    dn = ("NCHW", "OIHW", "NCHW")
    y = lax.conv_general_dilated(x_nchw, w1, (2, 2), ((1, 1), (1, 1)),
                                 dimension_numbers=dn,
                                 precision=lax.Precision.HIGHEST)
    y = y + b1[None, :, None, None]
    y = jnp.where(y >= 0, y, neg_slope * y)
    y = lax.conv_general_dilated(y, w2, (1, 1), ((1, 1), (1, 1)),
                                 dimension_numbers=dn,
                                 precision=lax.Precision.HIGHEST)
    mean = y.mean(axis=(0, 2, 3), keepdims=True)
    var = ((y - mean) ** 2).mean(axis=(0, 2, 3), keepdims=True)
    y = (y - mean) / jnp.sqrt(var + eps)
    y = y * gamma[None, :, None, None] + beta[None, :, None, None]
    return jnp.where(y >= 0, y, neg_slope * y)


if __name__ == "__main__":
    # DiscriminatorLayer(channel_input=4, channel_middle=8) on (2, 4, 16, 16).
    N, Cin, H, W = 2, 4, 16, 16
    Cmid = 8

    key = jax.random.PRNGKey(0)
    k = jax.random.split(key, 6)
    x = jax.random.normal(k[0], (N, Cin, H, W), jnp.float32)
    w1 = 0.1 * jax.random.normal(k[1], (Cmid, Cin, 3, 3), jnp.float32)
    b1 = 0.1 * jax.random.normal(k[2], (Cmid,), jnp.float32)
    w2 = 0.1 * jax.random.normal(k[3], (2 * Cmid, Cmid, 3, 3), jnp.float32)
    gamma = 1.0 + 0.1 * jax.random.normal(k[4], (2 * Cmid,), jnp.float32)
    beta = 0.1 * jax.random.normal(k[5], (2 * Cmid,), jnp.float32)
    params = (w1, b1, w2, gamma, beta)

    fwd = jax.jit(discriminator_layer)
    out = jax.block_until_ready(fwd(x, params))
    ref = jax.block_until_ready(reference(x, params))

    assert out.shape == (N, 2 * Cmid, H // 2, W // 2), out.shape
    max_err = float(jnp.max(jnp.abs(out - ref)))
    # bf16 MXU operands with f32 accumulation (BN stats kept in f32): allow a
    # slightly looser tolerance than a pure-f32 pipeline.
    assert jnp.allclose(out, ref, rtol=4e-2, atol=4e-2), max_err
    print("KERNEL_OK")
</pallas_src>

<mosaic_0001>
module attributes {stable_mosaic.version = 11 : i64} {
  func.func @_conv_stats_kernel(%arg0: i32, %arg1: memref<4x9x9x4xbf16, #tpu.memory_space<vmem>>, %arg2: memref<36x8xbf16, #tpu.memory_space<vmem>>, %arg3: memref<1x8xf32, #tpu.memory_space<vmem>>, %arg4: memref<72x16xbf16, #tpu.memory_space<vmem>>, %arg5: memref<1x64x16xf32, #tpu.memory_space<vmem>>, %arg6: memref<1x2x16xf32, #tpu.memory_space<vmem>>, %arg7: memref<10x10x8xf32, #tpu.memory_space<vmem>>) attributes {dimension_semantics = [#tpu.dimension_semantics<parallel>], iteration_bounds = array<i64: 2>, scalar_prefetch = 0 : i64, scratch_operands = 1 : i64, tpu.core_type = #tpu.core_type<tc>, window_params = [{transform_indices = @transform_0, window_bounds = array<i64: 4, 9, 9, 4>}, {pipeline_mode = #tpu.pipeline_mode<synchronous>, transform_indices = @transform_1, window_bounds = array<i64: 36, 8>}, {pipeline_mode = #tpu.pipeline_mode<synchronous>, transform_indices = @transform_2, window_bounds = array<i64: 1, 8>}, {pipeline_mode = #tpu.pipeline_mode<synchronous>, transform_indices = @transform_3, window_bounds = array<i64: 72, 16>}, {transform_indices = @transform_4, window_bounds = array<i64: 1, 64, 16>}, {transform_indices = @transform_5, window_bounds = array<i64: 1, 2, 16>}]} {
    %c0 = arith.constant 0 : index
    %c0_0 = arith.constant 0 : index
    %c0_1 = arith.constant 0 : index
    %c0_2 = arith.constant 0 : index
    %0 = vector.load %arg1[%c0, %c0_0, %c0_1, %c0_2] : memref<4x9x9x4xbf16, #tpu.memory_space<vmem>>, vector<1x9x9x4xbf16>
    %1 = vector.shape_cast %0 : vector<1x9x9x4xbf16> to vector<9x9x4xbf16>
    %2 = arith.extf %1 : vector<9x9x4xbf16> to vector<9x9x4xf32>
    %c1 = arith.constant 1 : index
    %c0_3 = arith.constant 0 : index
    %c0_4 = arith.constant 0 : index
    %c0_5 = arith.constant 0 : index
    %3 = vector.load %arg1[%c1, %c0_3, %c0_4, %c0_5] : memref<4x9x9x4xbf16, #tpu.memory_space<vmem>>, vector<1x9x9x4xbf16>
    %4 = vector.shape_cast %3 : vector<1x9x9x4xbf16> to vector<9x9x4xbf16>
    %5 = arith.extf %4 : vector<9x9x4xbf16> to vector<9x9x4xf32>
    %c2 = arith.constant 2 : index
    %c0_6 = arith.constant 0 : index
    %c0_7 = arith.constant 0 : index
    %c0_8 = arith.constant 0 : index
    %6 = vector.load %arg1[%c2, %c0_6, %c0_7, %c0_8] : memref<4x9x9x4xbf16, #tpu.memory_space<vmem>>, vector<1x9x9x4xbf16>
    %7 = vector.shape_cast %6 : vector<1x9x9x4xbf16> to vector<9x9x4xbf16>
    %8 = arith.extf %7 : vector<9x9x4xbf16> to vector<9x9x4xf32>
    %c3 = arith.constant 3 : index
    %c0_9 = arith.constant 0 : index
    %c0_10 = arith.constant 0 : index
    %c0_11 = arith.constant 0 : index
    %9 = vector.load %arg1[%c3, %c0_9, %c0_10, %c0_11] : memref<4x9x9x4xbf16, #tpu.memory_space<vmem>>, vector<1x9x9x4xbf16>
    %10 = vector.shape_cast %9 : vector<1x9x9x4xbf16> to vector<9x9x4xbf16>
    %11 = arith.extf %10 : vector<9x9x4xbf16> to vector<9x9x4xf32>
    %12 = vector.extract_strided_slice %2 {offsets = [0, 0, 0], sizes = [8, 8, 4], strides = [1, 1, 1]} : vector<9x9x4xf32> to vector<8x8x4xf32>
    %13 = vector.extract_strided_slice %5 {offsets = [0, 0, 0], sizes = [8, 8, 4], strides = [1, 1, 1]} : vector<9x9x4xf32> to vector<8x8x4xf32>
    %14 = vector.extract_strided_slice %2 {offsets = [0, 1, 0], sizes = [8, 8, 4], strides = [1, 1, 1]} : vector<9x9x4xf32> to vector<8x8x4xf32>
    %15 = vector.extract_strided_slice %8 {offsets = [0, 0, 0], sizes = [8, 8, 4], strides = [1, 1, 1]} : vector<9x9x4xf32> to vector<8x8x4xf32>
    %16 = vector.extract_strided_slice %11 {offsets = [0, 0, 0], sizes = [8, 8, 4], strides = [1, 1, 1]} : vector<9x9x4xf32> to vector<8x8x4xf32>
    %17 = vector.extract_strided_slice %8 {offsets = [0, 1, 0], sizes = [8, 8, 4], strides = [1, 1, 1]} : vector<9x9x4xf32> to vector<8x8x4xf32>
    %18 = vector.extract_strided_slice %2 {offsets = [1, 0, 0], sizes = [8, 8, 4], strides = [1, 1, 1]} : vector<9x9x4xf32> to vector<8x8x4xf32>
    %19 = vector.extract_strided_slice %5 {offsets = [1, 0, 0], sizes = [8, 8, 4], strides = [1, 1, 1]} : vector<9x9x4xf32> to vector<8x8x4xf32>
    %20 = vector.extract_strided_slice %2 {offsets = [1, 1, 0], sizes = [8, 8, 4], strides = [1, 1, 1]} : vector<9x9x4xf32> to vector<8x8x4xf32>
    %21 = tpu.concatenate %12, %13, %14, %15, %16, %17, %18, %19, %20 in 2 : vector<8x8x4xf32>, vector<8x8x4xf32>, vector<8x8x4xf32>, vector<8x8x4xf32>, vector<8x8x4xf32>, vector<8x8x4xf32>, vector<8x8x4xf32>, vector<8x8x4xf32>, vector<8x8x4xf32> -> vector<8x8x36xf32>
    %22 = vector.shape_cast %21 : vector<8x8x36xf32> to vector<64x36xf32>
    %23 = arith.truncf %22 : vector<64x36xf32> to vector<64x36xbf16>
    %c0_12 = arith.constant 0 : index
    %c0_13 = arith.constant 0 : index
    %24 = vector.load %arg2[%c0_12, %c0_13] : memref<36x8xbf16, #tpu.memory_space<vmem>>, vector<36x8xbf16>
    %cst = arith.constant dense<0.000000e+00> : vector<64x8xf32>
    %25 = tpu.matmul %23, %24, %cst {dimension_numbers = #tpu.dot_dimension_numbers<[1], [0], [0], [1], [0, 0, 1, 1], [], []>} : vector<64x36xbf16>, vector<36x8xbf16>, vector<64x8xf32> -> vector<64x8xf32>
    %c0_14 = arith.constant 0 : index
    %c0_15 = arith.constant 0 : index
    %26 = vector.load %arg3[%c0_14, %c0_15] : memref<1x8xf32, #tpu.memory_space<vmem>>, vector<1x8xf32>
    %27 = vector.broadcast %26 : vector<1x8xf32> to vector<64x8xf32>
    %28 = arith.addf %25, %27 : vector<64x8xf32>
    %cst_16 = arith.constant 0.000000e+00 : f32
    %29 = vector.broadcast %cst_16 : f32 to vector<64x8xf32>
    %30 = arith.cmpf oge, %28, %29 : vector<64x8xf32>
    %cst_17 = arith.constant 2.000000e-01 : f32
    %31 = vector.broadcast %cst_17 : f32 to vector<64x8xf32>
    %32 = arith.mulf %31, %28 : vector<64x8xf32>
    %33 = arith.select %30, %28, %32 : vector<64x8xi1>, vector<64x8xf32>
    %cst_18 = arith.constant 0.000000e+00 : f32
    %34 = vector.broadcast %cst_18 : f32 to vector<1x10x8xf32>
    %c0_19 = arith.constant 0 : index
    %c0_20 = arith.constant 0 : index
    %c0_21 = arith.constant 0 : index
    %35 = vector.load %arg7[%c0_19, %c0_20, %c0_21] : memref<10x10x8xf32, #tpu.memory_space<vmem>>, vector<1x10x8xf32>
    tpu.vector_store %arg7[%c0_19, %c0_20, %c0_21], %34 {strides = array<i32>} : memref<10x10x8xf32, #tpu.memory_space<vmem>>, vector<1x10x8xf32>,
    %cst_22 = arith.constant 0.000000e+00 : f32
    %36 = vector.broadcast %cst_22 : f32 to vector<1x10x8xf32>
    %c9 = arith.constant 9 : index
    %c0_23 = arith.constant 0 : index
    %c0_24 = arith.constant 0 : index
    %37 = vector.load %arg7[%c9, %c0_23, %c0_24] : memref<10x10x8xf32, #tpu.memory_space<vmem>>, vector<1x10x8xf32>
    tpu.vector_store %arg7[%c9, %c0_23, %c0_24], %36 {strides = array<i32>} : memref<10x10x8xf32, #tpu.memory_space<vmem>>, vector<1x10x8xf32>,
    %cst_25 = arith.constant 0.000000e+00 : f32
    %38 = vector.broadcast %cst_25 : f32 to vector<10x1x8xf32>
    %c0_26 = arith.constant 0 : index
    %c0_27 = arith.constant 0 : index
    %c0_28 = arith.constant 0 : index
    %39 = vector.load %arg7[%c0_26, %c0_27, %c0_28] : memref<10x10x8xf32, #tpu.memory_space<vmem>>, vector<10x1x8xf32>
    tpu.vector_store %arg7[%c0_26, %c0_27, %c0_28], %38 {strides = array<i32>} : memref<10x10x8xf32, #tpu.memory_space<vmem>>, vector<10x1x8xf32>,
    %cst_29 = arith.constant 0.000000e+00 : f32
    %40 = vector.broadcast %cst_29 : f32 to vector<10x1x8xf32>
    %c0_30 = arith.constant 0 : index
    %c9_31 = arith.constant 9 : index
    %c0_32 = arith.constant 0 : index
    %41 = vector.load %arg7[%c0_30, %c9_31, %c0_32] : memref<10x10x8xf32, #tpu.memory_space<vmem>>, vector<10x1x8xf32>
    tpu.vector_store %arg7[%c0_30, %c9_31, %c0_32], %40 {strides = array<i32>} : memref<10x10x8xf32, #tpu.memory_space<vmem>>, vector<10x1x8xf32>,
    %42 = vector.shape_cast %33 : vector<64x8xf32> to vector<8x8x8xf32>
    %c1_33 = arith.constant 1 : index
    %c1_34 = arith.constant 1 : index
    %c0_35 = arith.constant 0 : index
    %43 = vector.load %arg7[%c1_33, %c1_34, %c0_35] : memref<10x10x8xf32, #tpu.memory_space<vmem>>, vector<8x8x8xf32>
    tpu.vector_store %arg7[%c1_33, %c1_34, %c0_35], %42 {strides = array<i32>} : memref<10x10x8xf32, #tpu.memory_space<vmem>>, vector<8x8x8xf32>,
    %c0_36 = arith.constant 0 : index
    %c0_37 = arith.constant 0 : index
    %c0_38 = arith.constant 0 : index
    %44 = vector.load %arg7[%c0_36, %c0_37, %c0_38] : memref<10x10x8xf32, #tpu.memory_space<vmem>>, vector<8x8x8xf32>
    %c0_39 = arith.constant 0 : index
    %c1_40 = arith.constant 1 : index
    %c0_41 = arith.constant 0 : index
    %45 = vector.load %arg7[%c0_39, %c1_40, %c0_41] : memref<10x10x8xf32, #tpu.memory_space<vmem>>, vector<8x8x8xf32>
    %c0_42 = arith.constant 0 : index
    %c2_43 = arith.constant 2 : index
    %c0_44 = arith.constant 0 : index
    %46 = vector.load %arg7[%c0_42, %c2_43, %c0_44] : memref<10x10x8xf32, #tpu.memory_space<vmem>>, vector<8x8x8xf32>
    %c1_45 = arith.constant 1 : index
    %c0_46 = arith.constant 0 : index
    %c0_47 = arith.constant 0 : index
    %47 = vector.load %arg7[%c1_45, %c0_46, %c0_47] : memref<10x10x8xf32, #tpu.memory_space<vmem>>, vector<8x8x8xf32>
    %c1_48 = arith.constant 1 : index
    %c1_49 = arith.constant 1 : index
    %c0_50 = arith.constant 0 : index
    %48 = vector.load %arg7[%c1_48, %c1_49, %c0_50] : memref<10x10x8xf32, #tpu.memory_space<vmem>>, vector<8x8x8xf32>
    %c1_51 = arith.constant 1 : index
    %c2_52 = arith.constant 2 : index
    %c0_53 = arith.constant 0 : index
    %49 = vector.load %arg7[%c1_51, %c2_52, %c0_53] : memref<10x10x8xf32, #tpu.memory_space<vmem>>, vector<8x8x8xf32>
    %c2_54 = arith.constant 2 : index
    %c0_55 = arith.constant 0 : index
    %c0_56 = arith.constant 0 : index
    %50 = vector.load %arg7[%c2_54, %c0_55, %c0_56] : memref<10x10x8xf32, #tpu.memory_space<vmem>>, vector<8x8x8xf32>
    %c2_57 = arith.constant 2 : index
    %c1_58 = arith.constant 1 : index
    %c0_59 = arith.constant 0 : index
    %51 = vector.load %arg7[%c2_57, %c1_58, %c0_59] : memref<10x10x8xf32, #tpu.memory_space<vmem>>, vector<8x8x8xf32>
    %c2_60 = arith.constant 2 : index
    %c2_61 = arith.constant 2 : index
    %c0_62 = arith.constant 0 : index
    %52 = vector.load %arg7[%c2_60, %c2_61, %c0_62] : memref<10x10x8xf32, #tpu.memory_space<vmem>>, vector<8x8x8xf32>
    %53 = tpu.concatenate %44, %45, %46, %47, %48, %49, %50, %51, %52 in 2 : vector<8x8x8xf32>, vector<8x8x8xf32>, vector<8x8x8xf32>, vector<8x8x8xf32>, vector<8x8x8xf32>, vector<8x8x8xf32>, vector<8x8x8xf32>, vector<8x8x8xf32>, vector<8x8x8xf32> -> vector<8x8x72xf32>
    %54 = vector.shape_cast %53 : vector<8x8x72xf32> to vector<64x72xf32>
    %55 = arith.truncf %54 : vector<64x72xf32> to vector<64x72xbf16>
    %c0_63 = arith.constant 0 : index
    %c0_64 = arith.constant 0 : index
    %56 = vector.load %arg4[%c0_63, %c0_64] : memref<72x16xbf16, #tpu.memory_space<vmem>>, vector<72x16xbf16>
    %cst_65 = arith.constant dense<0.000000e+00> : vector<64x16xf32>
    %57 = tpu.matmul %55, %56, %cst_65 {dimension_numbers = #tpu.dot_dimension_numbers<[1], [0], [0], [1], [0, 0, 1, 1], [], []>} : vector<64x72xbf16>, vector<72x16xbf16>, vector<64x16xf32> -> vector<64x16xf32>
    %cst_66 = arith.constant dense<0.000000e+00> : vector<16xf32>
    %58 = vector.multi_reduction <add>, %57, %cst_66 [0] : vector<64x16xf32> to vector<16xf32>
    %59 = vector.shape_cast %58 : vector<16xf32> to vector<1x16xf32>
    %c0_67 = arith.constant 0 : index
    %c0_68 = arith.constant 0 : index
    %c0_69 = arith.constant 0 : index
    %60 = vector.load %arg6[%c0_67, %c0_68, %c0_69] : memref<1x2x16xf32, #tpu.memory_space<vmem>>, vector<1x1x16xf32>
    %61 = vector.shape_cast %60 : vector<1x1x16xf32> to vector<1x16xf32>
    %62 = vector.shape_cast %59 : vector<1x16xf32> to vector<1x1x16xf32>
    tpu.vector_store %arg6[%c0_67, %c0_68, %c0_69], %62 {strides = array<i32>} : memref<1x2x16xf32, #tpu.memory_space<vmem>>, vector<1x1x16xf32>,
    %63 = arith.mulf %57, %57 : vector<64x16xf32>
    %cst_70 = arith.constant dense<0.000000e+00> : vector<16xf32>
    %64 = vector.multi_reduction <add>, %63, %cst_70 [0] : vector<64x16xf32> to vector<16xf32>
    %65 = vector.shape_cast %64 : vector<16xf32> to vector<1x16xf32>
    %c0_71 = arith.constant 0 : index
    %c1_72 = arith.constant 1 : index
    %c0_73 = arith.constant 0 : index
    %66 = vector.load %arg6[%c0_71, %c1_72, %c0_73] : memref<1x2x16xf32, #tpu.memory_space<vmem>>, vector<1x1x16xf32>
    %67 = vector.shape_cast %66 : vector<1x1x16xf32> to vector<1x16xf32>
    %68 = vector.shape_cast %65 : vector<1x16xf32> to vector<1x1x16xf32>
    tpu.vector_store %arg6[%c0_71, %c1_72, %c0_73], %68 {strides = array<i32>} : memref<1x2x16xf32, #tpu.memory_space<vmem>>, vector<1x1x16xf32>,
    %69 = vector.shape_cast %57 : vector<64x16xf32> to vector<1x64x16xf32>
    %c0_74 = arith.constant 0 : index
    %c0_75 = arith.constant 0 : index
    %c0_76 = arith.constant 0 : index
    %70 = vector.load %arg5[%c0_74, %c0_75, %c0_76] : memref<1x64x16xf32, #tpu.memory_space<vmem>>, vector<1x64x16xf32>
    tpu.vector_store %arg5[%c0_74, %c0_75, %c0_76], %69 {strides = array<i32>} : memref<1x64x16xf32, #tpu.memory_space<vmem>>, vector<1x64x16xf32>,
    return
  }
  func.func @transform_0(%arg0: i32) -> (i32, i32, i32, i32) {
    %c0_i32 = arith.constant 0 : i32
    %c0_i32_0 = arith.constant 0 : i32
    %c0_i32_1 = arith.constant 0 : i32
    %c0_i32_2 = arith.constant 0 : i32
    return %arg0, %c0_i32, %c0_i32_0, %c0_i32_1 : i32, i32, i32, i32
  }
  func.func @transform_1(%arg0: i32) -> (i32, i32) {
    %c0_i32 = arith.constant 0 : i32
    %c0_i32_0 = arith.constant 0 : i32
    %c0_i32_1 = arith.constant 0 : i32
    return %c0_i32, %c0_i32_0 : i32, i32
  }
  func.func @transform_2(%arg0: i32) -> (i32, i32) {
    %c0_i32 = arith.constant 0 : i32
    %c0_i32_0 = arith.constant 0 : i32
    %c0_i32_1 = arith.constant 0 : i32
    return %c0_i32, %c0_i32_0 : i32, i32
  }
  func.func @transform_3(%arg0: i32) -> (i32, i32) {
    %c0_i32 = arith.constant 0 : i32
    %c0_i32_0 = arith.constant 0 : i32
    %c0_i32_1 = arith.constant 0 : i32
    return %c0_i32, %c0_i32_0 : i32, i32
  }
  func.func @transform_4(%arg0: i32) -> (i32, i32, i32) {
    %c0_i32 = arith.constant 0 : i32
    %c0_i32_0 = arith.constant 0 : i32
    %c0_i32_1 = arith.constant 0 : i32
    return %arg0, %c0_i32, %c0_i32_0 : i32, i32, i32
  }
  func.func @transform_5(%arg0: i32) -> (i32, i32, i32) {
    %c0_i32 = arith.constant 0 : i32
    %c0_i32_0 = arith.constant 0 : i32
    %c0_i32_1 = arith.constant 0 : i32
    return %arg0, %c0_i32, %c0_i32_0 : i32, i32, i32
  }
}

module attributes {stable_mosaic.version = 11 : i64} {
  func.func @_bn_leaky_kernel(%arg0: i32, %arg1: memref<1x8x128xf32, #tpu.memory_space<vmem>>, %arg2: memref<1x128xf32, #tpu.memory_space<vmem>>, %arg3: memref<1x128xf32, #tpu.memory_space<vmem>>, %arg4: memref<1x8x128xf32, #tpu.memory_space<vmem>>) attributes {dimension_semantics = [#tpu.dimension_semantics<parallel>], iteration_bounds = array<i64: 2>, scalar_prefetch = 0 : i64, scratch_operands = 0 : i64, tpu.core_type = #tpu.core_type<tc>, window_params = [{transform_indices = @transform_0, window_bounds = array<i64: 1, 8, 128>}, {pipeline_mode = #tpu.pipeline_mode<synchronous>, transform_indices = @transform_1, window_bounds = array<i64: 1, 128>}, {pipeline_mode = #tpu.pipeline_mode<synchronous>, transform_indices = @transform_2, window_bounds = array<i64: 1, 128>}, {transform_indices = @transform_3, window_bounds = array<i64: 1, 8, 128>}]} {
    %c0 = arith.constant 0 : index
    %c0_0 = arith.constant 0 : index
    %0 = vector.load %arg2[%c0, %c0_0] : memref<1x128xf32, #tpu.memory_space<vmem>>, vector<1x128xf32>
    %1 = vector.shape_cast %0 : vector<1x128xf32> to vector<1x1x128xf32>
    %c0_1 = arith.constant 0 : index
    %c0_2 = arith.constant 0 : index
    %2 = vector.load %arg3[%c0_1, %c0_2] : memref<1x128xf32, #tpu.memory_space<vmem>>, vector<1x128xf32>
    %3 = vector.shape_cast %2 : vector<1x128xf32> to vector<1x1x128xf32>
    %c0_3 = arith.constant 0 : index
    %c0_4 = arith.constant 0 : index
    %c0_5 = arith.constant 0 : index
    %4 = vector.load %arg1[%c0_3, %c0_4, %c0_5] : memref<1x8x128xf32, #tpu.memory_space<vmem>>, vector<1x8x128xf32>
    %5 = vector.broadcast %1 : vector<1x1x128xf32> to vector<1x8x128xf32>
    %6 = arith.mulf %4, %5 : vector<1x8x128xf32>
    %7 = vector.broadcast %3 : vector<1x1x128xf32> to vector<1x8x128xf32>
    %8 = arith.addf %6, %7 : vector<1x8x128xf32>
    %cst = arith.constant 0.000000e+00 : f32
    %9 = vector.broadcast %cst : f32 to vector<1x8x128xf32>
    %10 = arith.cmpf oge, %8, %9 : vector<1x8x128xf32>
    %cst_6 = arith.constant 2.000000e-01 : f32
    %11 = vector.broadcast %cst_6 : f32 to vector<1x8x128xf32>
    %12 = arith.mulf %11, %8 : vector<1x8x128xf32>
    %13 = arith.select %10, %8, %12 : vector<1x8x128xi1>, vector<1x8x128xf32>
    %c0_7 = arith.constant 0 : index
    %c0_8 = arith.constant 0 : index
    %c0_9 = arith.constant 0 : index
    %14 = vector.load %arg4[%c0_7, %c0_8, %c0_9] : memref<1x8x128xf32, #tpu.memory_space<vmem>>, vector<1x8x128xf32>
    tpu.vector_store %arg4[%c0_7, %c0_8, %c0_9], %13 {strides = array<i32>} : memref<1x8x128xf32, #tpu.memory_space<vmem>>, vector<1x8x128xf32>,
    return
  }
  func.func @transform_0(%arg0: i32) -> (i32, i32, i32) {
    %c0_i32 = arith.constant 0 : i32
    %c0_i32_0 = arith.constant 0 : i32
    %c0_i32_1 = arith.constant 0 : i32
    return %arg0, %c0_i32, %c0_i32_0 : i32, i32, i32
  }
  func.func @transform_1(%arg0: i32) -> (i32, i32) {
    %c0_i32 = arith.constant 0 : i32
    %c0_i32_0 = arith.constant 0 : i32
    %c0_i32_1 = arith.constant 0 : i32
    return %c0_i32, %c0_i32_0 : i32, i32
  }
  func.func @transform_2(%arg0: i32) -> (i32, i32) {
    %c0_i32 = arith.constant 0 : i32
    %c0_i32_0 = arith.constant 0 : i32
    %c0_i32_1 = arith.constant 0 : i32
    return %c0_i32, %c0_i32_0 : i32, i32
  }
  func.func @transform_3(%arg0: i32) -> (i32, i32, i32) {
    %c0_i32 = arith.constant 0 : i32
    %c0_i32_0 = arith.constant 0 : i32
    %c0_i32_1 = arith.constant 0 : i32
    return %arg0, %c0_i32, %c0_i32_0 : i32, i32, i32
  }
}

</mosaic_0001>

<bundles_post_ra>
// kernel: tile.13
= control target key start
LH: loop header
LB: loop body
LE: loop exit
PB: predicated region body
PF: predicated region fallthrough
CT: control target
= control target key end

     0   :  { %s22_s0 = inlined_call_operand.vmem [shape: f32[16], index: 0, kind: input, shape index: {}]   ;;  %s23_s1 = inlined_call_operand.vmem [shape: f32[8,16], index: 1, kind: output, shape index: {}]  }
   0x1   :  { %v4_v0 = vld [vmem:[%s22_s0] ss:$0 sm:$0xff] }
   0x2   :  { %5 = vst [vmem:[%s23_s1] sm:$0xff] %v4_v0 }

// kernel: tile.14
= control target key start
LH: loop header
LB: loop body
LE: loop exit
PB: predicated region body
PF: predicated region fallthrough
CT: control target
= control target key end

     0   :  { %s67_s10 = smov 112   ;;  %s68_s11 = smov 80   ;;  %vm3_vm0 = vcmask 130048   ;;  %vm9_vm1 = vcmask 1048448   ;;  %vm15_vm2 = vcmask 917248   ;;  %vm21_vm3 = vcmask 786048   ;;  %s111_s0 = inlined_call_operand.vmem [shape: f32[8,16], index: 0, kind: input, shape index: {}]   ;;  %s112_s1 = inlined_call_operand.vmem [shape: f32[1,128], index: 1, kind: output, shape index: {}]  }
   0x1   :  { %v53_v0 = vld [vmem:[%s111_s0 + $0x7] sm:$0x1]   ;;  %v55_v1 = vld [vmem:[%s111_s0 + $0x5] sm:$0x1]   ;;  %v54_v2 = vld [vmem:[%s111_s0 + $0x6] sm:$0x1]  }
   0x2   :  { %7 = vrot.lane.b32.xlu0 %v53_v0, %s67_s10  ;;  %19 = vrot.lane.b32.xlu1 %v55_v1, %s68_s11  ;;  %v56_v3 = vld [vmem:[%s111_s0 + $0x4] sm:$0x1]   ;;  %v2_v4 = vld [vmem:[%s111_s0] sm:$0x1]   ;;  %s69_s18 = smov 96   ;;  %s70_s19 = smov 64  }
   0x3   :  { %4 = vst.msk [vmem:[#allocation0] sm:$0x1] %vm3_vm0, %v2_v4   ;;  %v57_v5 = vld [vmem:[%s111_s0 + $0x3] sm:$0x1]   ;;  %v58_v6 = vld [vmem:[%s111_s0 + $0x2] sm:$0x1]  }
   0x4   :  { %s71_s24 = smov 48   ;;  %s72_s25 = smov 32   ;;  %v59_v7 = vld [vmem:[%s111_s0 + $0x1] sm:$0x1]   ;;  %vm27_vm4 = vcmask 654848   ;;  %vm33_vm5 = vcmask 523648  }
   0x5   :  { %s73_s0 = smov 16   ;;  %vm39_vm6 = vcmask 392448   ;;  %vm45_vm7 = vcmask 261248  }
   0x6   :  { %13 = vrot.lane.b32.xlu0 %v54_v2, %s69_s18  ;;  %25 = vrot.lane.b32.xlu1 %v56_v3, %s70_s19 }
   0xa   :  { %31 = vrot.lane.b32.xlu0 %v57_v5, %s71_s24  ;;  %37 = vrot.lane.b32.xlu1 %v58_v6, %s72_s25 }
   0xe   :  { %43 = vrot.lane.b32.xlu0 %v59_v7, %s73_s0 }
  0x74   :  { %v8_v8 = vpop.permute.xlu0 %7   ;;  %v20_v9 = vpop.permute.xlu1 %19  }
  0x75   :  { %10 = vst.msk [vmem:[#allocation0] sm:$0x1] %vm9_vm1, %v8_v8  }
  0x78   :  { %v14_v10 = vpop.permute.xlu0 %13   ;;  %v26_v11 = vpop.permute.xlu1 %25  }
  0x79   :  { %16 = vst.msk [vmem:[#allocation0] sm:$0x1] %vm15_vm2, %v14_v10  }
  0x7a   :  { %22 = vst.msk [vmem:[#allocation0] sm:$0x1] %vm21_vm3, %v20_v9  }
  0x7b   :  { %28 = vst.msk [vmem:[#allocation0] sm:$0x1] %vm27_vm4, %v26_v11  }
  0x7c   :  { %v32_v12 = vpop.permute.xlu0 %31   ;;  %v38_v13 = vpop.permute.xlu1 %37  }
  0x7d   :  { %34 = vst.msk [vmem:[#allocation0] sm:$0x1] %vm33_vm5, %v32_v12  }
  0x7e   :  { %40 = vst.msk [vmem:[#allocation0] sm:$0x1] %vm39_vm6, %v38_v13  }
  0x80   :  { %v44_v14 = vpop.permute.xlu0 %43  }
  0x81   :  { %46 = vst.msk [vmem:[#allocation0] sm:$0x1] %vm45_vm7, %v44_v14  }
  0x88   :  { %v50_v15 = vld [vmem:[#allocation0] sm:$0x1] }
  0x89   :  { %52 = vst [vmem:[%s112_s1] sm:$0x1] %v50_v15 }

// kernel: discriminator_layer.3
= control target key start
LH: loop header
LB: loop body
LE: loop exit
PB: predicated region body
PF: predicated region fallthrough
CT: control target
= control target key end

     0   :  { %s263_s12 = smov 0   ;;  %s299_s0 = inlined_call_operand.vmem [shape: f32[2,8,128], index: 0, kind: input, shape index: {}]   ;;  %s300_s1 = inlined_call_operand.vmem [shape: f32[1,128], index: 1, kind: input, shape index: {}]   ;;  %s301_s2 = inlined_call_operand.vmem [shape: f32[1,128], index: 2, kind: input, shape index: {}]   ;;  %s302_s3 = inlined_call_operand.vmem [shape: f32[2,8,128], index: 3, kind: output, shape index: {}]  }
   0x1 LB: > { %s240_s13 = sadd.s32 4294967295, %s265_s12   ;;  %p244_p0 = scmp.ge.s32.totalorder %s265_s12, 1  ;;  %s265_s12 = sphi %s263_s12, %s13_s12  }
   0x2   : > { %p136_p1 = scmp.lt.s32.totalorder %s265_s12, 3 }
   0x4   : > { %p137_p2 = pnand %p244_p0, %p136_p1 }
   0x5   : > { %p158_p3 = scmp.lt.s32.totalorder (!%p137_p2), %s240_s13, 1  ;;  %v247_v0 = vld [vmem:[%s300_s1] ss:$0 sm:$0xff] (!%p137_p2) }
   0x6   : > { %140 = sbr.rel (%p137_p2) target bundleno = 25 (0x19), region = 32  ;;  %v248_v1 = vld [vmem:[%s301_s2] ss:$0 sm:$0xff] (!%p137_p2) }
   0xd   : > { %s304_s13 = smov (!%p158_p3, %s240_s13), 1 }
   0xe   : > { %s245_s14 = sshll.u32 %s304_s13, 3 }
   0xf   : > { %s161_s19 = scalar_lea.vmem %s299_s0, %s245_s14  ;;  %s165_s24 = scalar_lea.vmem %s302_s3, %s245_s14 }
  0x10   : > { %v168_v2 = vld [vmem:[%s161_s19] sm:$0xff] }
  0x11   : > { %v175_v3 = vmul.f32 %v247_v0, %v168_v2 }
  0x13   : > { %v182_v4 = vadd.f32 %v248_v1, %v175_v3 }
  0x15   : > { %vm183_vm0 = vcmp.ge.f32.partialorder %v182_v4, 0.0  ;;  %v184_v5 = vmul.f32 0.2, %v182_v4 }
  0x17   : > { %v185_v6 = vsel %vm183_vm0, %v182_v4, %v184_v5 }
  0x18   : > { %186 = vst [vmem:[%s165_s24] sm:$0xff] %v185_v6 }
  0x19 PF: > { %s13_s12 = sadd.s32 1, %s265_s12  }
  0x1a   : > { %p10_p4 = scmp.ge.s32.totalorder %s13_s12, 4  }
  0x1c   :  { %12 = sbr.rel (!%p10_p4) target bundleno = 1 (0x1), region = 62 }

// kernel: discriminator_layer.2
= control target key start
LH: loop header
LB: loop body
LE: loop exit
PB: predicated region body
PF: predicated region fallthrough
CT: control target
= control target key end

     0   :  { %s2067_s18 = smov 0   ;;  %s2619_s0 = inlined_call_operand.vmem [shape: bf16[8,9,9,4], index: 0, kind: input, shape index: {}]   ;;  %s2620_s1 = inlined_call_operand.vmem [shape: bf16[36,8], index: 1, kind: input, shape index: {}]   ;;  %s2621_s2 = inlined_call_operand.vmem [shape: f32[1,8], index: 2, kind: input, shape index: {}]   ;;  %s2622_s3 = inlined_call_operand.vmem [shape: bf16[72,16], index: 3, kind: input, shape index: {}]   ;;  %s2623_s4 = inlined_call_operand.vmem [shape: f32[2,64,16], index: 4, kind: output, shape index: {0}]   ;;  %s2624_s5 = inlined_call_operand.vmem [shape: f32[2,2,16], index: 5, kind: output, shape index: {1}]  }
   0x1 LB: > { %s2073_s19 = sadd.s32 4294967295, %s2022_s18   ;;  %p1557_p0 = scmp.ge.s32.totalorder %s2022_s18, 1  ;;  %s2022_s18 = sphi %s2067_s18, %s16_s18  }
   0x2   : > { %p192_p1 = scmp.lt.s32.totalorder %s2022_s18, 3 }
   0x4   : > { %p193_p2 = pnand %p1557_p0, %p192_p1 }
   0x5   : > { %s1558_s20 = sshll.u32 (!%p193_p2), %s2073_s19, 2  ;;  %vm395_vm0 = vcmask (!%p193_p2), 1046528   ;;  %s2024_s25 = smov (!%p193_p2), 12   ;;  %vm758_vm1 = vcmask (!%p193_p2), 1041408   ;;  %vm642_vm2 = vcmask (!%p193_p2), 31744   ;;  %vm651_vm3 = vcmask (!%p193_p2), 64512  }
   0x6   : > { %196 = sbr.rel (%p193_p2) target bundleno = 829 (0x33d), region = 36  ;;  %p226_p3 = scmp.lt.s32.totalorder (!%p193_p2), %s1558_s20, 7  ;;  %vm660_vm4 = vcmask (!%p193_p2), 97280   ;;  %vm669_vm5 = vcmask (!%p193_p2), 130048   ;;  %vm678_vm6 = vcmask (!%p193_p2), 162816   ;;  %vm687_vm7 = vcmask (!%p193_p2), 195584  }
   0x7   : > { %s2025_s26 = smov (!%p193_p2), 4   ;;  %s2026_s27 = smov (!%p193_p2), 16   ;;  %vm696_vm8 = vcmask (!%p193_p2), 228352   ;;  %vm705_vm9 = vcmask (!%p193_p2), 261120   ;;  %vm745_vm10 = vcmask (!%p193_p2), 293888   ;;  %vm852_vm11 = vcmask (!%p193_p2), 58368  }
   0x8   : > { %s2027_s28 = smov (!%p193_p2), 8   ;;  %s2028_s8 = smov (!%p193_p2), 20   ;;  %vm857_vm12 = vcmask (!%p193_p2), 57344  }
   0x9   : > { %s2029_s9 = smov (!%p193_p2), 24   ;;  %s2030_s10 = smov (!%p193_p2), 28  }
   0xa   : > { %s2031_s13 = smov (!%p193_p2), 32   ;;  %s2034_s29 = smov (!%p193_p2), 48  }
   0xb   : > { %s2035_s7 = smov (!%p193_p2), 56   ;;  %p232_p4 = scmp.lt.s32.totalorder (!%p193_p2), %s2073_s19, 1 }
   0xd   : > { %s2626_s20 = smov (!%p226_p3, %s1558_s20), 7  ;;  %s2628_s19 = smov (!%p232_p4, %s2073_s19), 1 }
   0xe   : > { %s1666_s21 = smul.u32 72, %s2626_s20  ;;  %s2033_s20 = smov 40  }
   0xf   : > { %s1562_s11 = sshll.u32 %s2628_s19, 1 }
  0x10   : > { %s2081_s24 = scalar_lea.vmem %s2619_s0, %s1666_s21  ;;  %s240_s14 = scalar_lea.vmem %s2624_s5, %s1562_s11 }
  0x11   : > { %v2084_v0 = vld [vmem:[%s2081_s24 + $0xa0] ss:$8 sps:$4 sm:$0xff]   ;;  %v1572_v8 = vld [vmem:[%s2081_s24 + $0x90] ss:$8 sps:$4 sm:$0xff]   ;;  %v243_v14 = vld [vmem:[%s2081_s24 + $0x4] sm:$0x1] }
  0x12   : > { %v2087_v1 = vld [vmem:[%s2081_s24 + $0x48] ss:$8 sps:$4 sm:$0xff]   ;;  %v318_v3 = vunpack.c.l.bf16 %v2084_v0  ;;  %v320_v4 = vunpack.c.h.bf16 %v2084_v0  ;;  %v2095_v7 = vld [vmem:[%s2081_s24 + $0x58] ss:$8 sps:$4 sm:$0xff]   ;;  %v245_v15 = vld [vmem:[%s2081_s24 + $0xc] sm:$0x1]  ;;  %v314_v21 = vunpack.c.l.bf16 %v1572_v8  ;;  %v316_v22 = vunpack.c.h.bf16 %v1572_v8 }
  0x13   : > { %v1590_v2 = vld [vmem:[%s2081_s24 + $0xe8] ss:$8 sps:$4 sm:$0xff]   ;;  %v288_v5 = vunpack.c.l.bf16 %v2087_v1  ;;  %v289_v6 = vunpack.c.h.bf16 %v2087_v1  ;;  %v290_v11 = vunpack.c.l.bf16 %v2095_v7  ;;  %v291_v12 = vunpack.c.h.bf16 %v2095_v7  ;;  %v1588_v18 = vld [vmem:[%s2081_s24 + $0xd8] ss:$8 sps:$4 sm:$0xff]   ;;  %v247_v28 = vld [vmem:[%s2081_s24 + $0x14] sm:$0x1] }
  0x14   : > { %v341_v9 = vunpack.c.l.bf16 %v1590_v2  ;;  %v342_v10 = vunpack.c.h.bf16 %v1590_v2  ;;  %v2101_v13 = vld [vmem:[%s2081_s24] ss:$8 sps:$4 sm:$0xff]   ;;  %v1703_v16 = vpack.i.bf16 %v320_v4, %v318_v3  ;;  %v261_v24 = vunpack.c.l.bf16 %v243_v14  ;;  %v246_v27 = vld [vmem:[%s2081_s24 + $0x10] ss:$8 sps:$4 sm:$0xff]   ;;  %v249_v33 = vld [vmem:[%s2081_s24 + $0x1c] sm:$0x1] }
  0x15   : > { %v1688_v17 = vpack.i.bf16 %v289_v6, %v288_v5  ;;  %v1693_v20 = vpack.i.bf16 %v291_v12, %v290_v11  ;;  %v260_v23 = vunpack.c.l.bf16 %v2101_v13  ;;  %v2116_v25 = vunpack.c.h.bf16 %v2101_v13  ;;  %v1573_v34 = vld [vmem:[%s2081_s24 + $0x94] sm:$0x1]  ;;  %v1575_v43 = vld [vmem:[%s2081_s24 + $0x9c] sm:$0x1]  ;;  %v1577_v48 = vld [vmem:[%s2081_s24 + $0xa4] sm:$0x1] }
  0x16   : > { %v1713_v19 = vpack.i.bf16 %v342_v10, %v341_v9  ;;  %1704 = vrot.lane.b32.xlu1 %v1703_v16, %s2024_s25  ;;  %v263_v26 = vunpack.c.l.bf16 %v245_v15  ;;  %v525_v29 = vrot.slane %v320_v4, 1  ;;  %v519_v30 = vrot.slane %v316_v22, 1  ;;  %v1579_v49 = vld [vmem:[%s2081_s24 + $0xac] sm:$0x1]  ;;  %v250_v8 = vld [vmem:[%s2081_s24 + $0x20] ss:$72 sps:$4 sm:$0xff]  }
  0x17   : > { %1689 = vrot.lane.b32.xlu0 %v1688_v17, %s2025_s26  ;;  %v1698_v31 = vpack.i.bf16 %v316_v22, %v314_v21  ;;  %v339_v32 = vunpack.c.l.bf16 %v1588_v18  ;;  %v396_v35 = vrot.slane %v260_v23, 1  ;;  %v397_v36 = vrot.slane %v261_v24, 1  ;;  %v2008_v15 = vld [vmem:[%s2620_s1] sm:$0xff]  }
  0x18   : > { %v399_v37 = vrot.slane %v2116_v25, 1  ;;  %v400_v38 = vrot.slane %v263_v26, 1  ;;  %v340_v39 = vunpack.c.h.bf16 %v1588_v18  ;;  %v2125_v40 = vunpack.c.l.bf16 %v246_v27  ;;  %1632 = vmatprep.subr.bf16.mxu0 %v2008_v15  ;;  %v2174_v26 = vld [vmem:[%s2081_s24 + $0x70] ss:$8 sps:$4 sm:$0xff]  }
  0x19   : > { %v265_v41 = vunpack.c.l.bf16 %v247_v28  ;;  %v2127_v42 = vunpack.c.h.bf16 %v246_v27  ;;  %v398_v44 = vsel %vm395_vm0, %v396_v35, %v397_v36  ;;  %v267_v46 = vunpack.c.l.bf16 %v249_v33  ;;  %1633 = vmatpush3.bf16.msra.mxu0 %v2008_v15  ;;  %v2177_v28 = vld [vmem:[%s2081_s24 + $0x28] ss:$88 sps:$4 sm:$0xff]  }
  0x1a   : > { %1714 = vrot.lane.b32.xlu1 %v1713_v19, %s2026_s27  ;;  %v2134_v45 = vsel %vm395_vm0, %v399_v37, %v400_v38  ;;  %v315_v47 = vunpack.c.l.bf16 %v1573_v34  ;;  %v516_v50 = vrot.slane %v314_v21, 1  ;;  %v402_v52 = vrot.slane %v2125_v40, 1  ;;  %v251_v19 = vld [vmem:[%s2081_s24 + $0x24] sm:$0x1]  ;;  %v2009_v21 = vld [vmem:[%s2620_s1 + $0x8] sm:$0xff]  }
  0x1b   : > { %1694 = vrot.lane.b32.xlu0 %v1693_v20, %s2025_s26  ;;  %v1718_v51 = vpack.i.bf16 %v2134_v45, %v398_v44  ;;  %v403_v53 = vrot.slane %v265_v41, 1  ;;  %v405_v54 = vrot.slane %v2127_v42, 1  ;;  %v406_v55 = vrot.slane %v267_v46, 1  ;;  %1634 = vmatprep.subr.bf16.mxu0 %v2009_v21 }
  0x1c   : > { %v317_v56 = vunpack.c.l.bf16 %v1575_v43  ;;  %v517_v57 = vrot.slane %v315_v47, 1  ;;  %v522_v58 = vrot.slane %v318_v3, 1  ;;  %v319_v60 = vunpack.c.l.bf16 %v1577_v48 }
  0x1d   : > { %v2142_v59 = vsel %vm395_vm0, %v402_v52, %v403_v53  ;;  %v321_v61 = vunpack.c.l.bf16 %v1579_v49  ;;  %v1708_v62 = vpack.i.bf16 %v340_v39, %v339_v32  ;;  %v2147_v63 = vsel %vm395_vm0, %v405_v54, %v406_v55  ;;  %v257_v32 = vld [vmem:[%s2081_s24 + $0x3c] sm:$0x1]  ;;  %1635 = vmatpush3.bf16.msra.mxu0 %v2009_v21  ;;  %v1580_v52 = vld [vmem:[%s2081_s24 + $0xb0] ss:$8 sps:$4 sm:$0xff]  }
  0x1e   : > { %1719 = vrot.lane.b32.xlu1 %v1718_v51, %s2027_s28  ;;  %v520_v0 = vrot.slane %v317_v56, 1  ;;  %v1723_v2 = vpack.i.bf16 %v2147_v63, %v2142_v59  ;;  %v518_v3 = vsel %vm395_vm0, %v516_v50, %v517_v57  ;;  %v523_v4 = vrot.slane %v319_v60, 1  ;;  %v2010_v53 = vld [vmem:[%s2620_s1 + $0x10] ss:$0 sps:$4 sm:$0x33]  }
  0x1f   : > { %1699 = vrot.lane.b32.xlu0 %v1698_v31, %s2024_s25  ;;  %v526_v5 = vrot.slane %v321_v61, 1  ;;  %v2161_v18 = vunpack.c.l.bf16 %v250_v8  ;;  %v292_v20 = vunpack.c.h.bf16 %v250_v8  ;;  %v1738_v22 = vpack.i.bf16 %v2125_v40, %v2116_v25  ;;  %v255_v31 = vld [vmem:[%s2081_s24 + $0x34] sm:$0x1]  ;;  %v1584_v56 = vld [vmem:[%s2081_s24 + $0xc0] ss:$8 sps:$4 sm:$0xff]   ;;  %1664 = vmatprep.subr.msk.bf16.mxu0 %vm758_vm1, %v2010_v53 }
  0x20   : > { %v521_v9 = vsel %vm395_vm0, %v519_v30, %v520_v0  ;;  %v524_v10 = vsel %vm395_vm0, %v522_v58, %v523_v4  ;;  %v269_v27 = vunpack.c.l.bf16 %v251_v19  ;;  %v254_v30 = vld [vmem:[%s2081_s24 + $0x30] ss:$8 sps:$4 sm:$0xff]   ;;  %v1748_v33 = vpack.i.bf16 %v290_v11, %v289_v6  ;;  %v1581_v60 = vld [vmem:[%s2081_s24 + $0xb4] sm:$0x1]  ;;  %v1583_v61 = vld [vmem:[%s2081_s24 + $0xbc] sm:$0x1] }
  0x21   : > { %v527_v14 = vsel %vm395_vm0, %v525_v29, %v526_v5  ;;  %v1728_v16 = vpack.i.bf16 %v521_v9, %v518_v3  ;;  %v1743_v24 = vpack.i.bf16 %v2161_v18, %v2127_v42  ;;  %v253_v29 = vld [vmem:[%s2081_s24 + $0x2c] sm:$0x1]  ;;  %v1753_v34 = vpack.i.bf16 %v292_v20, %v291_v12 }
  0x22   : > { %1724 = vrot.lane.b32.xlu1 %v1723_v2, %s2027_s28  ;;  %v1733_v17 = vpack.i.bf16 %v527_v14, %v524_v10  ;;  %v293_v35 = vunpack.c.l.bf16 %v2174_v26  ;;  %v408_v36 = vrot.slane %v2161_v18, 1  ;;  %v409_v37 = vrot.slane %v269_v27, 1  ;;  %v1587_v0 = vld [vmem:[%s2081_s24 + $0xcc] sm:$0x1]  ;;  %v1592_v10 = vld [vmem:[%s2081_s24 + $0xf8] ss:$8 sps:$4 sm:$0xff]  }
  0x23   : > { %1709 = vrot.lane.b32.xlu0 %v1708_v62, %s2026_s27  ;;  %v2194_v38 = vunpack.c.l.bf16 %v2177_v28  ;;  %v271_v1 = vunpack.c.l.bf16 %v253_v29  ;;  %v2196_v39 = vunpack.c.l.bf16 %v254_v30  ;;  %v273_v6 = vunpack.c.l.bf16 %v255_v31  ;;  %v1594_v14 = vld [vmem:[%s2081_s24 + $0x108] ss:$8 sps:$4 sm:$0xff]  }
  0x24   : > { %v2198_v11 = vunpack.c.h.bf16 %v254_v30  ;;  %v275_v7 = vunpack.c.l.bf16 %v257_v32  ;;  %v1758_v12 = vpack.i.bf16 %v2142_v59, %v2134_v45  ;;  %v1763_v41 = vpack.i.bf16 %v293_v35, %v292_v20 }
  0x25   : > { %v294_v43 = vunpack.c.h.bf16 %v2174_v26  ;;  %v410_v44 = vsel %vm395_vm0, %v408_v36, %v409_v37  ;;  %v295_v46 = vunpack.c.h.bf16 %v2177_v28  ;;  %v411_v47 = vrot.slane %v2194_v38, 1 }
  0x26   : > { %1734 = vrot.lane.b32.xlu1 %v1733_v17, %s2028_s8  ;;  %v412_v48 = vrot.slane %v271_v1, 1  ;;  %v414_v45 = vrot.slane %v2196_v39, 1  ;;  %v415_v49 = vrot.slane %v273_v6, 1  ;;  %v417_v50 = vrot.slane %v2198_v11, 1 }
  0x27   : > { %1729 = vrot.lane.b32.xlu0 %v1728_v16, %s2028_s8  ;;  %v418_v51 = vrot.slane %v275_v7, 1  ;;  %v1768_v54 = vpack.i.bf16 %v410_v44, %v2147_v63  ;;  %v1773_v55 = vpack.i.bf16 %v295_v46, %v294_v43  ;;  %v322_v62 = vunpack.c.l.bf16 %v1580_v52  ;;  %v1585_v63 = vld [vmem:[%s2081_s24 + $0xc4] sm:$0x1] }
  0x28   : > { %v2225_v57 = vsel %vm395_vm0, %v411_v47, %v412_v48  ;;  %v2228_v58 = vsel %vm395_vm0, %v414_v45, %v415_v49  ;;  %v324_v2 = vunpack.c.h.bf16 %v1580_v52  ;;  %v326_v3 = vunpack.c.l.bf16 %v1584_v56  ;;  %v258_v48 = vld [vmem:[%s2081_s24 + $0x40] ss:$72 sps:$4 sm:$0xff]   ;;  %v259_v45 = vld [vmem:[%s2081_s24 + $0x44] sm:$0x1] }
  0x29   : > { %v2231_v59 = vsel %vm395_vm0, %v417_v50, %v418_v51  ;;  %v328_v4 = vunpack.c.h.bf16 %v1584_v56  ;;  %v760_v5 = vsel %vm758_vm1, %v2010_v53, 0  ;;  %v1778_v8 = vpack.i.bf16 %v2225_v57, %v410_v44 }
  0x2a   : > { %1744 = vrot.lane.b32.xlu1 %v1743_v24, %s2029_s9  ;;  %v1783_v9 = vpack.i.bf16 %v2231_v59, %v2228_v58  ;;  %v323_v15 = vunpack.c.l.bf16 %v1581_v60  ;;  %v325_v16 = vunpack.c.l.bf16 %v1583_v61  ;;  %v327_v17 = vunpack.c.l.bf16 %v1585_v63  ;;  %1637 = vmatpush3.bf16.msra.mxu0 %v760_v5 }
  0x2b   : > { %1739 = vrot.lane.b32.xlu0 %v1738_v22, %s2029_s9  ;;  %v329_v19 = vunpack.c.l.bf16 %v1587_v0  ;;  %v531_v20 = vrot.slane %v324_v2, 1  ;;  %v528_v21 = vrot.slane %v322_v62, 1  ;;  %v1788_v22 = vpack.i.bf16 %v324_v2, %v322_v62 }
  0x2c   : > { %v537_v24 = vrot.slane %v328_v4, 1  ;;  %v1793_v27 = vpack.i.bf16 %v328_v4, %v326_v3  ;;  %v534_v29 = vrot.slane %v326_v3, 1  ;;  %v343_v30 = vunpack.c.l.bf16 %v1592_v10 }
  0x2d   : > { %v344_v31 = vunpack.c.h.bf16 %v1592_v10  ;;  %v345_v32 = vunpack.c.l.bf16 %v1594_v14  ;;  %v532_v36 = vrot.slane %v325_v16, 1  ;;  %v535_v37 = vrot.slane %v327_v17, 1 }
  0x2e   : > { %1754 = vrot.lane.b32.xlu1 %v1753_v34, %s2030_s10  ;;  %v529_v34 = vrot.slane %v323_v15, 1  ;;  %v538_v1 = vrot.slane %v329_v19, 1  ;;  %v276_v51 = vunpack.c.l.bf16 %v258_v48  ;;  %v277_v52 = vunpack.c.l.bf16 %v259_v45 }
  0x2f   : > { %1749 = vrot.lane.b32.xlu0 %v1748_v33, %s2030_s10  ;;  %v346_v33 = vunpack.c.h.bf16 %v1594_v14  ;;  %v1798_v6 = vpack.i.bf16 %v344_v31, %v343_v30  ;;  %v536_v44 = vsel %vm395_vm0, %v534_v29, %v535_v37  ;;  %v1818_v53 = vpack.i.bf16 %v2196_v39, %v2194_v38 }
  0x30   : > { %v539_v47 = vsel %vm395_vm0, %v537_v24, %v538_v1  ;;  %v615_v56 = vrot.slane %v276_v51, 1  ;;  %v616_v60 = vrot.slane %v277_v52, 1  ;;  %v1828_v61 = vpack.i.bf16 %v294_v43, %v293_v35 }
  0x31   : > { %v1803_v7 = vpack.i.bf16 %v346_v33, %v345_v32  ;;  %v1813_v50 = vpack.i.bf16 %v539_v47, %v536_v44  ;;  %v1838_v0 = vpack.i.bf16 %v2228_v58, %v2225_v57 }
  0x32   : > { %1764 = vrot.lane.b32.xlu1 %v1763_v41, %s2025_s26  ;;  %v533_v41 = vsel %vm395_vm0, %v531_v20, %v532_v36  ;;  %v617_v63 = vsel %vm395_vm0, %v615_v56, %v616_v60 }
  0x33   : > { %1759 = vrot.lane.b32.xlu0 %v1758_v12, %s2031_s13  ;;  %v530_v12 = vsel %vm395_vm0, %v528_v21, %v529_v34  ;;  %v1843_v2 = vpack.i.bf16 %v617_v63, %v2231_v59 }
  0x34   : > { %v1808_v49 = vpack.i.bf16 %v533_v41, %v530_v12 }
  0x36   : > { %1774 = vrot.lane.b32.xlu1 %v1773_v55, %s2025_s26  ;;  %v296_v55 = vunpack.c.h.bf16 %v258_v48 }
  0x37   : > { %1769 = vrot.lane.b32.xlu0 %v1768_v54, %s2031_s13  ;;  %v1823_v54 = vpack.i.bf16 %v276_v51, %v2198_v11 }
  0x38   : > { %v1833_v62 = vpack.i.bf16 %v296_v55, %v295_v46 }
  0x3a   : > { %1784 = vrot.lane.b32.xlu1 %v1783_v9, %s2027_s28 }
  0x3b   : > { %1779 = vrot.lane.b32.xlu0 %v1778_v8, %s2027_s28 }
  0x3e   : > { %1794 = vrot.lane.b32.xlu1 %v1793_v27, %s2024_s25 }
  0x3f   : > { %1789 = vrot.lane.b32.xlu0 %v1788_v22, %s2024_s25 }
  0x42   : > { %1804 = vrot.lane.b32.xlu1 %v1803_v7, %s2026_s27 }
  0x43   : > { %1799 = vrot.lane.b32.xlu0 %v1798_v6, %s2026_s27 }
  0x46   : > { %1814 = vrot.lane.b32.xlu1 %v1813_v50, %s2028_s8 }
  0x47   : > { %1809 = vrot.lane.b32.xlu0 %v1808_v49, %s2028_s8  ;;  %s2036_s8 = smov 64  }
  0x4a   : > { %1824 = vrot.lane.b32.xlu1 %v1823_v54, %s2029_s9 }
  0x4b   : > { %1819 = vrot.lane.b32.xlu0 %v1818_v53, %s2029_s9 }
  0x4e   : > { %1834 = vrot.lane.b32.xlu1 %v1833_v62, %s2030_s10 }
  0x4f   : > { %1829 = vrot.lane.b32.xlu0 %v1828_v61, %s2030_s10 }
  0x52   : > { %1844 = vrot.lane.b32.xlu1 %v1843_v2, %s2031_s13 }
  0x53   : > { %1839 = vrot.lane.b32.xlu0 %v1838_v0, %s2031_s13 }
  0x88   : > { %v1705_v26 = vpop.permute.xlu1 %1704 }
  0x89   : > { %v1690_v35 = vpop.permute.xlu0 %1689  ;;  %v1707_v19 = vunpack.i.h.bf16 %v1705_v26  ;;  %v1706_v20 = vunpack.i.l.bf16 %v1705_v26 }
  0x8a   : > { %v1692_v8 = vunpack.i.h.bf16 %v1690_v35  ;;  %v1691_v9 = vunpack.i.l.bf16 %v1690_v35 }
  0x8c   : > { %v1715_v43 = vpop.permute.xlu1 %1714  ;;  %v643_v21 = vsel %vm642_vm2, %v260_v23, %v1691_v9  ;;  %v644_v22 = vsel %vm642_vm2, %v2116_v25, %v1692_v8 }
  0x8d   : > { %v1695_v28 = vpop.permute.xlu0 %1694  ;;  %v1717_v37 = vunpack.i.h.bf16 %v1715_v43  ;;  %v1716_v1 = vunpack.i.l.bf16 %v1715_v43 }
  0x8e   : > { %v1697_v10 = vunpack.i.h.bf16 %v1695_v28  ;;  %v1696_v14 = vunpack.i.l.bf16 %v1695_v28 }
  0x90   : > { %v1720_v3 = vpop.permute.xlu1 %1719  ;;  %v645_v24 = vsel %vm642_vm2, %v2125_v40, %v1696_v14  ;;  %v646_v27 = vsel %vm642_vm2, %v2127_v42, %v1697_v10 }
  0x91   : > { %v1700_v46 = vpop.permute.xlu0 %1699  ;;  %v1722_v16 = vunpack.i.h.bf16 %v1720_v3  ;;  %v1721_v17 = vunpack.i.l.bf16 %v1720_v3 }
  0x92   : > { %v1702_v31 = vunpack.i.h.bf16 %v1700_v46  ;;  %v1701_v32 = vunpack.i.l.bf16 %v1700_v46 }
  0x93   : > { %v653_v13 = vsel %vm651_vm3, %v644_v22, %v1722_v16  ;;  %v652_v23 = vsel %vm651_vm3, %v643_v21, %v1721_v17 }
  0x94   : > { %v1725_v5 = vpop.permute.xlu1 %1724  ;;  %v661_v44 = vsel %vm660_vm4, %v652_v23, %v1701_v32  ;;  %v662_v47 = vsel %vm660_vm4, %v653_v13, %v1702_v31 }
  0x95   : > { %v1710_v4 = vpop.permute.xlu0 %1709  ;;  %v1727_v58 = vunpack.i.h.bf16 %v1725_v5  ;;  %v1726_v59 = vunpack.i.l.bf16 %v1725_v5 }
  0x96   : > { %v1712_v36 = vunpack.i.h.bf16 %v1710_v4  ;;  %v1711_v25 = vunpack.i.l.bf16 %v1710_v4 }
  0x97   : > { %v655_v33 = vsel %vm651_vm3, %v646_v27, %v1727_v58  ;;  %v654_v34 = vsel %vm651_vm3, %v645_v24, %v1726_v59 }
  0x98   : > { %v2277_v57 = vpop.permute.xlu1 %1734  ;;  %v664_v40 = vsel %vm660_vm4, %v655_v33, %v1707_v19  ;;  %v663_v42 = vsel %vm660_vm4, %v654_v34, %v1706_v20  ;;  %v670_v49 = vsel %vm669_vm5, %v661_v44, %v1711_v25  ;;  %v671_v50 = vsel %vm669_vm5, %v662_v47, %v1712_v36 }
  0x99   : > { %v1730_v15 = vpop.permute.xlu0 %1729  ;;  %v1737_v53 = vunpack.i.h.bf16 %v2277_v57  ;;  %v1736_v54 = vunpack.i.l.bf16 %v2277_v57  ;;  %v672_v55 = vsel %vm669_vm5, %v663_v42, %v1716_v1  ;;  %v673_v56 = vsel %vm669_vm5, %v664_v40, %v1717_v37 }
  0x9a   : > { %v1732_v6 = vunpack.i.h.bf16 %v1730_v15  ;;  %v1731_v7 = vunpack.i.l.bf16 %v1730_v15 }
  0x9b   : > { %v681_v10 = vsel %vm678_vm6, %v672_v55, %v1736_v54  ;;  %v682_v14 = vsel %vm678_vm6, %v673_v56, %v1737_v53 }
  0x9c   : > { %v1745_v30 = vpop.permute.xlu1 %1744  ;;  %v679_v60 = vsel %vm678_vm6, %v670_v49, %v1731_v7  ;;  %v680_v61 = vsel %vm678_vm6, %v671_v50, %v1732_v6 }
  0x9d   : > { %v1740_v29 = vpop.permute.xlu0 %1739  ;;  %v1747_v62 = vunpack.i.h.bf16 %v1745_v30  ;;  %v1746_v63 = vunpack.i.l.bf16 %v1745_v30 }
  0x9e   : > { %v1742_v48 = vunpack.i.h.bf16 %v1740_v29  ;;  %v1741_v45 = vunpack.i.l.bf16 %v1740_v29 }
  0x9f   : > { %v690_v59 = vsel %vm687_vm7, %v681_v10, %v1746_v63  ;;  %v691_v16 = vsel %vm687_vm7, %v682_v14, %v1747_v62 }
  0xa0   : > { %v1755_v41 = vpop.permute.xlu1 %1754  ;;  %v688_v26 = vsel %vm687_vm7, %v679_v60, %v1741_v45  ;;  %v689_v35 = vsel %vm687_vm7, %v680_v61, %v1742_v48 }
  0xa1   : > { %v1750_v12 = vpop.permute.xlu0 %1749  ;;  %v1757_v46 = vunpack.i.h.bf16 %v1755_v41  ;;  %v1756_v3 = vunpack.i.l.bf16 %v1755_v41 }
  0xa2   : > { %v1752_v51 = vunpack.i.h.bf16 %v1750_v12  ;;  %v1751_v52 = vunpack.i.l.bf16 %v1750_v12 }
  0xa3   : > { %v699_v20 = vsel %vm696_vm8, %v690_v59, %v1756_v3  ;;  %v700_v21 = vsel %vm696_vm8, %v691_v16, %v1757_v46 }
  0xa4   : > { %v1765_v2 = vpop.permute.xlu1 %1764  ;;  %v697_v4 = vsel %vm696_vm8, %v688_v26, %v1751_v52  ;;  %v698_v5 = vsel %vm696_vm8, %v689_v35, %v1752_v51 }
  0xa5   : > { %v1760_v0 = vpop.permute.xlu0 %1759  ;;  %v1767_v13 = vunpack.i.h.bf16 %v1765_v2  ;;  %v1766_v23 = vunpack.i.l.bf16 %v1765_v2 }
  0xa6   : > { %v1762_v43 = vunpack.i.h.bf16 %v1760_v0  ;;  %v1761_v28 = vunpack.i.l.bf16 %v1760_v0 }
  0xa7   : > { %v648_v48 = vsel %vm642_vm2, %v2194_v38, %v1767_v13  ;;  %v647_v45 = vsel %vm642_vm2, %v2161_v18, %v1766_v23 }
  0xa8   : > { %v706_v8 = vsel %vm705_vm9, %v697_v4, %v1761_v28  ;;  %v707_v9 = vsel %vm705_vm9, %v698_v5, %v1762_v43  ;;  %v1775_v57 = vpop.permute.xlu1 %1774 }
  0xa9   : > { %v1770_v15 = vpop.permute.xlu0 %1769  ;;  %v714_v58 = vpack.c.bf16 %v707_v9, %v706_v8  ;;  %v1777_v36 = vunpack.i.h.bf16 %v1775_v57  ;;  %v1776_v25 = vunpack.i.l.bf16 %v1775_v57 }
  0xaa   : > { %v1772_v17 = vunpack.i.h.bf16 %v1770_v15  ;;  %v1771_v19 = vunpack.i.l.bf16 %v1770_v15 }
  0xab   : > { %1638 = vmatprep.mubr.msk.bf16.mxu0 %vm745_vm10, %v714_v58  ;;  %v650_v49 = vsel %vm642_vm2, %v2198_v11, %v1777_v36  ;;  %v649_v50 = vsel %vm642_vm2, %v2196_v39, %v1776_v25 }
  0xac   : > { %v708_v22 = vsel %vm705_vm9, %v699_v20, %v1771_v19  ;;  %v709_v24 = vsel %vm705_vm9, %v700_v21, %v1772_v17  ;;  %v1785_v30 = vpop.permute.xlu1 %1784 }
  0xad   : > { %v715_v27 = vpack.c.bf16 %v709_v24, %v708_v22  ;;  %v1780_v29 = vpop.permute.xlu0 %1779  ;;  %v1787_v40 = vunpack.i.h.bf16 %v1785_v30  ;;  %v1786_v42 = vunpack.i.l.bf16 %v1785_v30 }
  0xae   : > { %v1782_v37 = vunpack.i.h.bf16 %v1780_v29  ;;  %v1781_v1 = vunpack.i.l.bf16 %v1780_v29 }
  0xaf   : > { %1639 = vmatmul.mubr.msk.bf16.vlgmr.msra.gmra.mrb[0].mxu0 %vm745_vm10, %v715_v27  ;;  %v658_v53 = vsel %vm651_vm3, %v649_v50, %v1786_v42  ;;  %v659_v54 = vsel %vm651_vm3, %v650_v49, %v1787_v40 }
  0xb0   : > { %v1795_v32 = vpop.permute.xlu1 %1794  ;;  %v656_v51 = vsel %vm651_vm3, %v647_v45, %v1781_v1  ;;  %v657_v52 = vsel %vm651_vm3, %v648_v48, %v1782_v37 }
  0xb1   : > { %v1790_v31 = vpop.permute.xlu0 %1789  ;;  %v1797_v44 = vunpack.i.h.bf16 %v1795_v32  ;;  %v1796_v47 = vunpack.i.l.bf16 %v1795_v32 }
  0xb2   : > { %v1792_v12 = vunpack.i.h.bf16 %v1790_v31  ;;  %v1791_v41 = vunpack.i.l.bf16 %v1790_v31 }
  0xb3   : > { %v667_v39 = vsel %vm660_vm4, %v658_v53, %v1796_v47  ;;  %v668_v63 = vsel %vm660_vm4, %v659_v54, %v1797_v44 }
  0xb4   : > { %v1805_v34 = vpop.permute.xlu1 %1804  ;;  %v665_v62 = vsel %vm660_vm4, %v656_v51, %v1791_v41  ;;  %v666_v11 = vsel %vm660_vm4, %v657_v52, %v1792_v12  ;;  %v2032_v12 = vmov 0.0   ;;  %v2383_v41 = vld [vmem:[%s2621_s2] ss:$0 sm:$0xff] }
  0xb5   : > { %v1800_v33 = vpop.permute.xlu0 %1799  ;;  %v1807_v61 = vunpack.i.h.bf16 %v1805_v34  ;;  %v1806_v18 = vunpack.i.l.bf16 %v1805_v34  ;;  %851 = vst.msk [vmem:[#allocation2] sm:$0xff] %vm651_vm3, %v2032_v12  ;;  %855 = vst.msk [vmem:[#allocation2 + $0x90] sm:$0xff] %vm651_vm3, %v2032_v12 }
  0xb6   : > { %v1802_v38 = vunpack.i.h.bf16 %v1800_v33  ;;  %v1801_v60 = vunpack.i.l.bf16 %v1800_v33  ;;  %853 = vst.msk [vmem:[#allocation2 + $0x8] sm:$0x3] %vm852_vm11, %v2032_v12  ;;  %856 = vst.msk [vmem:[#allocation2 + $0x98] sm:$0x3] %vm852_vm11, %v2032_v12  ;;  %vm1257_vm11 = vcmask 392192  }
  0xb7   : > { %v676_v10 = vsel %vm669_vm5, %v667_v39, %v1806_v18  ;;  %v677_v14 = vsel %vm669_vm5, %v668_v63, %v1807_v61  ;;  %861 = vst.msk [vmem:[#allocation2 + $0x30] sm:$0x1] %vm857_vm12, %v2032_v12  ;;  %862 = vst.msk [vmem:[#allocation2 + $0x40] sm:$0x1] %vm857_vm12, %v2032_v12 }
  0xb8   : > { %v1815_v7 = vpop.permute.xlu1 %1814  ;;  %v674_v8 = vsel %vm669_vm5, %v665_v62, %v1801_v60  ;;  %v675_v9 = vsel %vm669_vm5, %v666_v11, %v1802_v38  ;;  %859 = vst.msk [vmem:[#allocation2 + $0x10] sm:$0x1] %vm857_vm12, %v2032_v12  ;;  %860 = vst.msk [vmem:[#allocation2 + $0x20] sm:$0x1] %vm857_vm12, %v2032_v12 }
  0xb9   : > { %v1810_v6 = vpop.permute.xlu0 %1809  ;;  %v1817_v26 = vunpack.i.h.bf16 %v1815_v7  ;;  %v1816_v35 = vunpack.i.l.bf16 %v1815_v7  ;;  %863 = vst.msk [vmem:[#allocation2 + $0x50] sm:$0x1] %vm857_vm12, %v2032_v12  ;;  %864 = vst.msk [vmem:[#allocation2 + $0x60] sm:$0x1] %vm857_vm12, %v2032_v12 }
  0xba   : > { %v1812_v0 = vunpack.i.h.bf16 %v1810_v6  ;;  %v1811_v2 = vunpack.i.l.bf16 %v1810_v6  ;;  %865 = vst.msk [vmem:[#allocation2 + $0x70] sm:$0x1] %vm857_vm12, %v2032_v12  ;;  %866 = vst.msk [vmem:[#allocation2 + $0x80] sm:$0x1] %vm857_vm12, %v2032_v12 }
  0xbb   : > { %v685_v19 = vsel %vm678_vm6, %v676_v10, %v1816_v35  ;;  %v686_v20 = vsel %vm678_vm6, %v677_v14, %v1817_v26  ;;  %869 = vst.msk [vmem:[#allocation2 + $0x19] sm:$0x1] %vm857_vm12, %v2032_v12  ;;  %870 = vst.msk [vmem:[#allocation2 + $0x29] sm:$0x1] %vm857_vm12, %v2032_v12  ;;  %v2011_v14 = vld [vmem:[%s2622_s3] sm:$0xff]  }
  0xbc   : > { %v1825_v56 = vpop.permute.xlu1 %1824  ;;  %v683_v16 = vsel %vm678_vm6, %v674_v8, %v1811_v2  ;;  %v684_v17 = vsel %vm678_vm6, %v675_v9, %v1812_v0  ;;  %871 = vst.msk [vmem:[#allocation2 + $0x39] sm:$0x1] %vm857_vm12, %v2032_v12  ;;  %872 = vst.msk [vmem:[#allocation2 + $0x49] sm:$0x1] %vm857_vm12, %v2032_v12  ;;  %1646 = vmatprep.subr.bf16.mxu1 %v2011_v14 }
  0xbd   : > { %v1820_v55 = vpop.permute.xlu0 %1819  ;;  %v1827_v46 = vunpack.i.h.bf16 %v1825_v56  ;;  %v1826_v3 = vunpack.i.l.bf16 %v1825_v56  ;;  %873 = vst.msk [vmem:[#allocation2 + $0x59] sm:$0x1] %vm857_vm12, %v2032_v12  ;;  %874 = vst.msk [vmem:[#allocation2 + $0x69] sm:$0x1] %vm857_vm12, %v2032_v12  ;;  %v895_v62 = vld [vmem:[#allocation2 + $0x1] sm:$0xff]  ;;  %1647 = vmatpush3.bf16.msra.mxu1 %v2011_v14 }
  0xbe   : > { %v1822_v43 = vunpack.i.h.bf16 %v1820_v55  ;;  %v1821_v28 = vunpack.i.l.bf16 %v1820_v55  ;;  %875 = vst.msk [vmem:[#allocation2 + $0x79] sm:$0x1] %vm857_vm12, %v2032_v12  ;;  %876 = vst.msk [vmem:[#allocation2 + $0x89] sm:$0x1] %vm857_vm12, %v2032_v12 }
  0xbf   : > { %v694_v24 = vsel %vm687_vm7, %v685_v19, %v1826_v3  ;;  %v695_v27 = vsel %vm687_vm7, %v686_v20, %v1827_v46  ;;  %858 = vst.msk [vmem:[#allocation2] sm:$0x1] %vm857_vm12, %v2032_v12  ;;  %867 = vst.msk [vmem:[#allocation2 + $0x90] sm:$0x1] %vm857_vm12, %v2032_v12  ;;  %v2013_v19 = vld [vmem:[%s2622_s3 + $0x10] sm:$0xff]  }
  0xc0   : > { %v1835_v5 = vpop.permute.xlu1 %1834  ;;  %v692_v21 = vsel %vm687_vm7, %v683_v16, %v1821_v28  ;;  %v693_v22 = vsel %vm687_vm7, %v684_v17, %v1822_v43  ;;  %868 = vst.msk [vmem:[#allocation2 + $0x9] sm:$0x1] %vm857_vm12, %v2032_v12  ;;  %877 = vst.msk [vmem:[#allocation2 + $0x99] sm:$0x1] %vm857_vm12, %v2032_v12  ;;  %vm1266_vm12 = vcmask 457728  }
  0xc1   : > { %v1830_v4 = vpop.permute.xlu0 %1829  ;;  %v1837_v58 = vunpack.i.h.bf16 %v1835_v5  ;;  %v1836_v59 = vunpack.i.l.bf16 %v1835_v5 }
  0xc2   : > { %v1832_v15 = vunpack.i.h.bf16 %v1830_v4  ;;  %v1831_v57 = vunpack.i.l.bf16 %v1830_v4 }
  0xc3   : > { %v703_v36 = vsel %vm696_vm8, %v694_v24, %v1836_v59  ;;  %v704_v25 = vsel %vm696_vm8, %v695_v27, %v1837_v58  ;;  %v2012_v58 = vld [vmem:[%s2622_s3 + $0x8] sm:$0xff]  }
  0xc4   : > { %v1845_v30 = vpop.permute.xlu1 %1844  ;;  %v701_v13 = vsel %vm696_vm8, %v692_v21, %v1831_v57  ;;  %v702_v23 = vsel %vm696_vm8, %v693_v22, %v1832_v15  ;;  %1648 = vmatprep.subr.bf16.mxu1 %v2012_v58  ;;  %vm1337_vm8 = vcmask 1043456  }
  0xc5   : > { %v1840_v29 = vpop.permute.xlu0 %1839  ;;  %v1847_v33 = vunpack.i.h.bf16 %v1845_v30  ;;  %v1846_v34 = vunpack.i.l.bf16 %v1845_v30  ;;  %1649 = vmatpush3.bf16.msra.mxu1 %v2012_v58 }
  0xc6   : > { %v1842_v31 = vunpack.i.h.bf16 %v1840_v29  ;;  %v1841_v32 = vunpack.i.l.bf16 %v1840_v29  ;;  %1650 = vmatprep.subr.bf16.mxu1 %v2013_v19 }
  0xc7   : > { %v712_v40 = vsel %vm705_vm9, %v703_v36, %v1846_v34  ;;  %v713_v42 = vsel %vm705_vm9, %v704_v25, %v1847_v33  ;;  %v903_v26 = vld [vmem:[#allocation2 + $0x2] sm:$0xff] }
  0xc8   : > { %v710_v37 = vsel %vm705_vm9, %v701_v13, %v1841_v32  ;;  %v711_v1 = vsel %vm705_vm9, %v702_v23, %v1842_v31  ;;  %v717_v7 = vpack.c.bf16 %v713_v42, %v712_v40  ;;  %v2014_v40 = vld [vmem:[%s2622_s3 + $0x18] sm:$0xff]  }
  0xc9   : > { %v716_v6 = vpack.c.bf16 %v711_v1, %v710_v37  ;;  %1651 = vmatpush3.bf16.msra.mxu1 %v2013_v19 }
  0xca   : > { %1652 = vmatprep.subr.bf16.mxu1 %v2014_v40 }
  0xcb   : > { %1642 = vmatprep.mubr.msk.bf16.mxu0 %vm745_vm10, %v716_v6 }
  0xcc   : > { %1643 = vmatmul.mubr.msk.bf16.gmra.mrb[4].mxu0 %vm745_vm10, %v717_v7  ;;  %v2015_v7 = vld [vmem:[%s2622_s3 + $0x20] ss:$0 sps:$4 sm:$0xff]   ;;  %vm1248_vm10 = vcmask 326656  }
  0xcd   : > { %1653 = vmatpush3.bf16.msra.mxu1 %v2014_v40  ;;  %v1339_v12 = vsel %vm1337_vm8, %v2015_v7, 0 }
  0xce   : > { %1665 = vmatprep.subr.msk.bf16.mxu1 %vm1337_vm8, %v2015_v7 }
  0xd1   : > { %1655 = vmatpush3.bf16.msra.mxu1 %v1339_v12 }
 0x182   : > { %v1640_v44 = vpop.f32.mrb[0].mxu0 }
 0x183   : > { %v805_v47 = vadd.f32 %v1640_v44, %v2383_v41  ;;  %v796_v48 = vpop.f32.mrb[1].mxu0 }
 0x184   : > { %v797_v45 = vadd.f32 %v2383_v41, %v796_v48  ;;  %v1641_v49 = vpop.f32.mrb[2].mxu0 }
 0x185   : > { %vm829_vm13 = vcmp.ge.f32.partialorder %v805_v47, 0.0  ;;  %v837_v50 = vmul.f32 0.2, %v805_v47  ;;  %v808_v51 = vadd.f32 %v1641_v49, %v2383_v41  ;;  %v799_v52 = vpop.f32.mrb[3].mxu0 }
 0x186   : > { %vm827_vm14 = vcmp.ge.f32.partialorder %v797_v45, 0.0  ;;  %v835_v53 = vmul.f32 0.2, %v797_v45  ;;  %v800_v54 = vadd.f32 %v2383_v41, %v799_v52 }
 0x187   : > { %v845_v55 = vsel %vm829_vm13, %v805_v47, %v837_v50  ;;  %vm830_vm15 = vcmp.ge.f32.partialorder %v808_v51, 0.0  ;;  %v838_v56 = vmul.f32 0.2, %v808_v51  ;;  %vm1275_vm13 = vcmask 523264  }
 0x188   : > { %881 = vst.msk [vmem:[#allocation2 + $0x31] sm:$0xff] %vm651_vm3, %v845_v55  ;;  %v843_v38 = vsel %vm827_vm14, %v797_v45, %v835_v53  ;;  %vm828_vm0 = vcmp.ge.f32.partialorder %v800_v54, 0.0  ;;  %v836_v60 = vmul.f32 0.2, %v800_v54  ;;  %vm1324_vm14 = vcmask 588800  }
 0x189   : > { %879 = vst.msk [vmem:[#allocation2 + $0x11] sm:$0xff] %vm651_vm3, %v843_v38  ;;  %v846_v61 = vsel %vm830_vm15, %v808_v51, %v838_v56 }
 0x18a   : > { %882 = vst.msk [vmem:[#allocation2 + $0x41] sm:$0xff] %vm651_vm3, %v846_v61  ;;  %v844_v18 = vsel %vm828_vm0, %v800_v54, %v836_v60 }
 0x18b   : > { %880 = vst.msk [vmem:[#allocation2 + $0x21] sm:$0xff] %vm651_vm3, %v844_v18 }
 0x18f   : > { %v2393_v63 = vld [vmem:[#allocation2 + $0x30] sm:$0xff] }
 0x190   : > { %v896_v11 = vld [vmem:[#allocation2 + $0x11] sm:$0xff] }
 0x191   : > { %v1848_v39 = vpack.i.bf16 %v896_v11, %v895_v62  ;;  %v2395_v0 = vld [vmem:[#allocation2 + $0x40] sm:$0xff]  ;;  %v904_v35 = vld [vmem:[#allocation2 + $0x12] sm:$0xff] }
 0x192   : > { %v1858_v2 = vpack.i.bf16 %v2395_v0, %v2393_v63  ;;  %v2400_v43 = vld [vmem:[#allocation2 + $0x41] sm:$0xff]  ;;  %v1853_v28 = vpack.i.bf16 %v904_v35, %v903_v26  ;;  %v921_v46 = vld [vmem:[#allocation2 + $0x31] sm:$0xff] }
 0x193   : > { %1849 = vrot.lane.b32.xlu0 %v1848_v39, %s2027_s28  ;;  %v1863_v3 = vpack.i.bf16 %v2400_v43, %v921_v46  ;;  %v2404_v4 = vld [vmem:[#allocation2 + $0x20] sm:$0xff]  ;;  %v2410_v8 = vld [vmem:[#allocation2 + $0x10] sm:$0xff] }
 0x194   : > { %1859 = vrot.lane.b32.xlu1 %v1858_v2, %s2029_s9  ;;  %v2407_v5 = vld [vmem:[#allocation2 + $0x42] sm:$0xff]  ;;  %v1883_v9 = vpack.i.bf16 %v2404_v4, %v2410_v8  ;;  %v929_v10 = vld [vmem:[#allocation2 + $0x32] sm:$0xff]  ;;  %v1898_v1 = vpack.i.bf16 %v2393_v63, %v2404_v4 }
 0x195   : > { %v1868_v15 = vpack.i.bf16 %v2407_v5, %v929_v10  ;;  %v920_v57 = vld [vmem:[#allocation2 + $0x21] sm:$0xff]  ;;  %v943_v26 = vld [vmem:[#allocation2 + $0x90] sm:$0xff] }
 0x196   : > { %v1888_v59 = vpack.i.bf16 %v920_v57, %v896_v11  ;;  %v1873_v16 = vpack.i.bf16 %v921_v46, %v920_v57  ;;  %v928_v17 = vld [vmem:[#allocation2 + $0x22] sm:$0xff] }
 0x197   : > { %1854 = vrot.lane.b32.xlu0 %v1853_v28, %s2026_s27  ;;  %v1893_v29 = vpack.i.bf16 %v928_v17, %v904_v35  ;;  %v1878_v33 = vpack.i.bf16 %v929_v10, %v928_v17 }
 0x198   : > { %1864 = vrot.lane.b32.xlu1 %v1863_v3, %s2031_s13  ;;  %v951_v3 = vld [vmem:[#allocation2 + $0x91] sm:$0xff] }
 0x19b   : > { %1884 = vrot.lane.b32.xlu0 %v1883_v9, %s2029_s9  ;;  %v959_v9 = vld [vmem:[#allocation2 + $0x92] sm:$0xff] }
 0x19c   : > { %1869 = vrot.lane.b32.xlu1 %v1868_v15, %s2033_s20 }
 0x19f   : > { %v1644_v20 = vpop.f32.mrb[4].mxu0  ;;  %1889 = vrot.lane.b32.xlu0 %v1888_v59, %s2031_s13 }
 0x1a0   : > { %v821_v21 = vadd.f32 %v1644_v20, %v2383_v41  ;;  %v812_v22 = vpop.f32.mrb[5].mxu0  ;;  %1874 = vrot.lane.b32.xlu1 %v1873_v16, %s2027_s28 }
 0x1a1   : > { %v813_v24 = vadd.f32 %v2383_v41, %v812_v22  ;;  %v1645_v27 = vpop.f32.mrb[6].mxu0 }
 0x1a2   : > { %vm833_vm1 = vcmp.ge.f32.partialorder %v821_v21, 0.0  ;;  %v841_v30 = vmul.f32 0.2, %v821_v21  ;;  %v824_v31 = vadd.f32 %v1645_v27, %v2383_v41  ;;  %v815_v32 = vpop.f32.mrb[7].mxu0  ;;  %v887_v27 = vld [vmem:[#allocation2] sm:$0xff] }
 0x1a3   : > { %vm831_vm2 = vcmp.ge.f32.partialorder %v813_v24, 0.0  ;;  %v839_v34 = vmul.f32 0.2, %v813_v24  ;;  %v816_v13 = vadd.f32 %v2383_v41, %v815_v32  ;;  %1894 = vrot.lane.b32.xlu0 %v1893_v29, %s2033_s20 }
 0x1a4   : > { %v849_v23 = vsel %vm833_vm1, %v821_v21, %v841_v30  ;;  %vm834_vm4 = vcmp.ge.f32.partialorder %v824_v31, 0.0  ;;  %v842_v36 = vmul.f32 0.2, %v824_v31  ;;  %1879 = vrot.lane.b32.xlu1 %v1878_v33, %s2026_s27 }
 0x1a5   : > { %885 = vst.msk [vmem:[#allocation2 + $0x71] sm:$0xff] %vm651_vm3, %v849_v23  ;;  %v847_v25 = vsel %vm831_vm2, %v813_v24, %v839_v34  ;;  %vm832_vm6 = vcmp.ge.f32.partialorder %v816_v13, 0.0  ;;  %v840_v37 = vmul.f32 0.2, %v816_v13 }
 0x1a6   : > { %883 = vst.msk [vmem:[#allocation2 + $0x51] sm:$0xff] %vm651_vm3, %v847_v25  ;;  %v850_v42 = vsel %vm834_vm4, %v824_v31, %v842_v36 }
 0x1a7   : > { %886 = vst.msk [vmem:[#allocation2 + $0x81] sm:$0xff] %vm651_vm3, %v850_v42  ;;  %v848_v6 = vsel %vm832_vm6, %v816_v13, %v840_v37  ;;  %1899 = vrot.lane.b32.xlu0 %v1898_v1, %s2034_s29 }
 0x1a8   : > { %884 = vst.msk [vmem:[#allocation2 + $0x61] sm:$0xff] %vm651_vm3, %v848_v6 }
 0x1ab   : > { %1904 = vrot.lane.b32.xlu0 %v1873_v16, %s2035_s7 }
 0x1ac   : > { %v2464_v53 = vld [vmem:[#allocation2 + $0x70] sm:$0xff] }
 0x1ad   : > { %v2448_v41 = vld [vmem:[#allocation2 + $0x50] sm:$0xff] }
 0x1ae   : > { %v1913_v44 = vpack.i.bf16 %v2448_v41, %v2395_v0  ;;  %v955_v47 = vld [vmem:[#allocation2 + $0x52] sm:$0xff]  ;;  %v918_v51 = vld [vmem:[#allocation2 + $0x80] sm:$0xff] }
 0x1af   : > { %1909 = vrot.lane.b32.xlu0 %v1878_v33, %s2036_s8  ;;  %v947_v48 = vld [vmem:[#allocation2 + $0x51] sm:$0xff]  ;;  %v1928_v45 = vpack.i.bf16 %v955_v47, %v2407_v5  ;;  %v2458_v50 = vld [vmem:[#allocation2 + $0x60] sm:$0xff]  ;;  %v1938_v54 = vpack.i.bf16 %v918_v51, %v2464_v53 }
 0x1b0   : > { %1914 = vrot.lane.b32.xlu1 %v1913_v44, %s2034_s29  ;;  %v1918_v49 = vpack.i.bf16 %v947_v48, %v2400_v43  ;;  %v1973_v52 = vpack.i.bf16 %v2458_v50, %v2448_v41  ;;  %v924_v55 = vld [vmem:[#allocation2 + $0x61] sm:$0xff]  ;;  %v925_v60 = vld [vmem:[#allocation2 + $0x71] sm:$0xff]  ;;  %v1988_v35 = vpack.i.bf16 %v2464_v53, %v2458_v50  ;;  %v1953_v43 = vpack.i.bf16 %v943_v26, %v918_v51 }
 0x1b1   : > { %v926_v56 = vld [vmem:[#allocation2 + $0x81] sm:$0xff]  ;;  %v1978_v38 = vpack.i.bf16 %v924_v55, %v947_v48  ;;  %v933_v39 = vld [vmem:[#allocation2 + $0x72] sm:$0xff]  ;;  %v1993_v28 = vpack.i.bf16 %v925_v60, %v924_v55 }
 0x1b2   : > { %v1943_v61 = vpack.i.bf16 %v926_v56, %v925_v60  ;;  %v932_v18 = vld [vmem:[#allocation2 + $0x62] sm:$0xff]  ;;  %v1968_v5 = vpack.i.bf16 %v951_v3, %v926_v56 }
 0x1b3   : > { %1929 = vrot.lane.b32.xlu0 %v1928_v45, %s2036_s8  ;;  %v934_v62 = vld [vmem:[#allocation2 + $0x82] sm:$0xff]  ;;  %v1983_v11 = vpack.i.bf16 %v932_v18, %v955_v47  ;;  %v1998_v46 = vpack.i.bf16 %v933_v39, %v932_v18 }
 0x1b4   : > { %1919 = vrot.lane.b32.xlu1 %v1918_v49, %s2035_s7  ;;  %v1948_v2 = vpack.i.bf16 %v934_v62, %v933_v39  ;;  %v2003_v10 = vpack.i.bf16 %v959_v9, %v934_v62 }
 0x1b7   : > { %1934 = vrot.lane.b32.xlu0 %v1928_v45, %s2026_s27 }
 0x1b8   : > { %1924 = vrot.lane.b32.xlu1 %v1918_v49, %s2027_s28 }
 0x1bb   : > { %1974 = vrot.lane.b32.xlu0 %v1973_v52, %s2029_s9 }
 0x1bc   : > { %1939 = vrot.lane.b32.xlu1 %v1938_v54, %s2029_s9 }
 0x1bf   : > { %1979 = vrot.lane.b32.xlu0 %v1978_v38, %s2031_s13 }
 0x1c0   : > { %1944 = vrot.lane.b32.xlu1 %v1943_v61, %s2031_s13 }
 0x1c3   : > { %1984 = vrot.lane.b32.xlu0 %v1983_v11, %s2033_s20 }
 0x1c4   : > { %1949 = vrot.lane.b32.xlu1 %v1948_v2, %s2033_s20 }
 0x1c7   : > { %1989 = vrot.lane.b32.xlu0 %v1988_v35, %s2034_s29 }
 0x1c8   : > { %1954 = vrot.lane.b32.xlu1 %v1953_v43, %s2034_s29 }
 0x1cb   : > { %1994 = vrot.lane.b32.xlu0 %v1993_v28, %s2035_s7 }
 0x1cc   : > { %1959 = vrot.lane.b32.xlu1 %v1993_v28, %s2027_s28 }
 0x1cf   : > { %1999 = vrot.lane.b32.xlu0 %v1998_v46, %s2036_s8 }
 0x1d0   : > { %1964 = vrot.lane.b32.xlu1 %v1998_v46, %s2026_s27  ;;  %s1615_s27 = sshll.u32 %s2628_s19, 6 }
 0x1d1   : > { %s2578_s10 = scalar_lea.vmem %s2623_s4, %s1615_s27 }
 0x1d4   : > { %1969 = vrot.lane.b32.xlu1 %v1968_v5, %s2035_s7 }
 0x1d8   : > { %2004 = vrot.lane.b32.xlu1 %v2003_v10, %s2036_s8 }
 0x205   : > { %v1850_v14 = vpop.permute.xlu0 %1849 }
 0x206   : > { %v1860_v15 = vpop.permute.xlu1 %1859  ;;  %v1852_v22 = vunpack.i.h.bf16 %v1850_v14  ;;  %v1851_v24 = vunpack.i.l.bf16 %v1850_v14 }
 0x207   : > { %v1862_v34 = vunpack.i.h.bf16 %v1860_v15  ;;  %v1861_v13 = vunpack.i.l.bf16 %v1860_v15 }
 0x208   : > { %v1216_v25 = vsel %vm651_vm3, %v887_v27, %v1851_v24  ;;  %v1217_v37 = vsel %vm651_vm3, %v2410_v8, %v1852_v22 }
 0x209   : > { %v1855_v57 = vpop.permute.xlu0 %1854 }
 0x20a   : > { %v1865_v58 = vpop.permute.xlu1 %1864  ;;  %v1857_v23 = vunpack.i.h.bf16 %v1855_v57  ;;  %v1856_v36 = vunpack.i.l.bf16 %v1855_v57 }
 0x20b   : > { %v1867_v62 = vunpack.i.h.bf16 %v1865_v58  ;;  %v1866_v11 = vunpack.i.l.bf16 %v1865_v58 }
 0x20c   : > { %v1224_v8 = vsel %vm669_vm5, %v1216_v25, %v1856_v36  ;;  %v1225_v51 = vsel %vm669_vm5, %v1217_v37, %v1857_v23 }
 0x20d   : > { %v1885_v59 = vpop.permute.xlu0 %1884 }
 0x20e   : > { %v2483_v16 = vpop.permute.xlu1 %1869  ;;  %v1887_v1 = vunpack.i.h.bf16 %v1885_v59  ;;  %v1886_v40 = vunpack.i.l.bf16 %v1885_v59 }
 0x210   : > { %v1232_v55 = vsel %vm687_vm7, %v1224_v8, %v1886_v40 }
 0x211   : > { %v1890_v17 = vpop.permute.xlu0 %1889 }
 0x212   : > { %v1875_v19 = vpop.permute.xlu1 %1874  ;;  %v1892_v42 = vunpack.i.h.bf16 %v1890_v17  ;;  %v1891_v6 = vunpack.i.l.bf16 %v1890_v17  ;;  %v1872_v17 = vunpack.i.h.bf16 %v2483_v16 }
 0x213   : > { %v1877_v29 = vunpack.i.h.bf16 %v1875_v19  ;;  %v1876_v30 = vunpack.i.l.bf16 %v1875_v19  ;;  %v1871_v19 = vunpack.i.l.bf16 %v2483_v16 }
 0x214   : > { %v1240_v38 = vsel %vm705_vm9, %v1232_v55, %v1891_v6 }
 0x215   : > { %v1895_v20 = vpop.permute.xlu0 %1894  ;;  %v1219_v7 = vsel %vm651_vm3, %v2393_v63, %v1877_v29  ;;  %v1218_v12 = vsel %vm651_vm3, %v2404_v4, %v1876_v30  ;;  %v1233_v63 = vsel %vm687_vm7, %v1225_v51, %v1887_v1 }
 0x216   : > { %v1880_v21 = vpop.permute.xlu1 %1879  ;;  %v1897_v44 = vunpack.i.h.bf16 %v1895_v20  ;;  %v1896_v47 = vunpack.i.l.bf16 %v1895_v20  ;;  %v1241_v60 = vsel %vm705_vm9, %v1233_v63, %v1892_v42 }
 0x217   : > { %v1882_v31 = vunpack.i.h.bf16 %v1880_v21  ;;  %v1881_v32 = vunpack.i.l.bf16 %v1880_v21 }
 0x218   : > { %v1249_v39 = vsel %vm1248_vm10, %v1240_v38, %v1896_v47  ;;  %v1250_v2 = vsel %vm1248_vm10, %v1241_v60, %v1897_v44 }
 0x219   : > { %v1900_v33 = vpop.permute.xlu0 %1899  ;;  %v1226_v48 = vsel %vm669_vm5, %v1218_v12, %v1881_v32  ;;  %v1227_v45 = vsel %vm669_vm5, %v1219_v7, %v1882_v31 }
 0x21a   : > { %v1902_v52 = vunpack.i.h.bf16 %v1900_v33  ;;  %v1901_v54 = vunpack.i.l.bf16 %v1900_v33  ;;  %v1234_v61 = vsel %vm687_vm7, %v1226_v48, %v1861_v13  ;;  %v1235_v18 = vsel %vm687_vm7, %v1227_v45, %v1862_v34 }
 0x21b   : > { %v1242_v5 = vsel %vm705_vm9, %v1234_v61, %v1866_v11  ;;  %v1243_v9 = vsel %vm705_vm9, %v1235_v18, %v1867_v62 }
 0x21c   : > { %v1258_v35 = vsel %vm1257_vm11, %v1249_v39, %v1901_v54  ;;  %v1259_v43 = vsel %vm1257_vm11, %v1250_v2, %v1902_v52  ;;  %v1251_v24 = vsel %vm1248_vm10, %v1242_v5, %v1871_v19  ;;  %v1252_v27 = vsel %vm1248_vm10, %v1243_v9, %v1872_v17 }
 0x21d   : > { %v1905_v49 = vpop.permute.xlu0 %1904 }
 0x21e   : > { %v1907_v56 = vunpack.i.h.bf16 %v1905_v49  ;;  %v1906_v4 = vunpack.i.l.bf16 %v1905_v49 }
 0x220   : > { %v1267_v10 = vsel %vm1266_vm12, %v1258_v35, %v1906_v4  ;;  %v1268_v14 = vsel %vm1266_vm12, %v1259_v43, %v1907_v56 }
 0x221   : > { %v1910_v26 = vpop.permute.xlu0 %1909 }
 0x222   : > { %v1912_v28 = vunpack.i.h.bf16 %v1910_v26  ;;  %v1911_v46 = vunpack.i.l.bf16 %v1910_v26  ;;  %v1915_v3 = vpop.permute.xlu1 %1914 }
 0x223   : > { %v1917_v15 = vunpack.i.h.bf16 %v1915_v3  ;;  %v1916_v57 = vunpack.i.l.bf16 %v1915_v3 }
 0x224   : > { %v1276_v58 = vsel %vm1275_vm13, %v1267_v10, %v1911_v46  ;;  %v1277_v59 = vsel %vm1275_vm13, %v1268_v14, %v1912_v28 }
 0x225   : > { %v1930_v20 = vpop.permute.xlu0 %1929  ;;  %v1284_v21 = vpack.c.bf16 %v1277_v59, %v1276_v58  ;;  %v1260_v31 = vsel %vm1257_vm11, %v1251_v24, %v1916_v57  ;;  %v1261_v32 = vsel %vm1257_vm11, %v1252_v27, %v1917_v15 }
 0x226   : > { %v1920_v22 = vpop.permute.xlu1 %1919  ;;  %v1932_v33 = vunpack.i.h.bf16 %v1930_v20  ;;  %v1931_v34 = vunpack.i.l.bf16 %v1930_v20 }
 0x227   : > { %v1922_v29 = vunpack.i.h.bf16 %v1920_v22  ;;  %v1921_v30 = vunpack.i.l.bf16 %v1920_v22  ;;  %1656 = vmatprep.mubr.msk.bf16.mxu1 %vm1324_vm14, %v1284_v21 }
 0x229   : > { %v1269_v13 = vsel %vm1266_vm12, %v1260_v31, %v1921_v30  ;;  %v1270_v16 = vsel %vm1266_vm12, %v1261_v32, %v1922_v29  ;;  %v1935_v23 = vpop.permute.xlu0 %1934 }
 0x22a   : > { %v1925_v36 = vpop.permute.xlu1 %1924  ;;  %v1278_v25 = vsel %vm1275_vm13, %v1269_v13, %v1931_v34  ;;  %v1279_v37 = vsel %vm1275_vm13, %v1270_v16, %v1932_v33  ;;  %v1937_v51 = vunpack.i.h.bf16 %v1935_v23  ;;  %v1936_v52 = vunpack.i.l.bf16 %v1935_v23 }
 0x22b   : > { %v1285_v1 = vpack.c.bf16 %v1279_v37, %v1278_v25  ;;  %v1927_v12 = vunpack.i.h.bf16 %v1925_v36  ;;  %v1926_v44 = vunpack.i.l.bf16 %v1925_v36 }
 0x22d   : > { %v1975_v40 = vpop.permute.xlu0 %1974  ;;  %1657 = vmatmul.mubr.msk.bf16.vlgmr.msra.gmra.mrb[0].mxu1 %vm1324_vm14, %v1285_v1  ;;  %v1221_v45 = vsel %vm651_vm3, %v2448_v41, %v1927_v12  ;;  %v1220_v49 = vsel %vm651_vm3, %v2395_v0, %v1926_v44 }
 0x22e   : > { %v1940_v42 = vpop.permute.xlu1 %1939  ;;  %v1977_v55 = vunpack.i.h.bf16 %v1975_v40  ;;  %v1976_v63 = vunpack.i.l.bf16 %v1975_v40  ;;  %v1228_v56 = vsel %vm669_vm5, %v1220_v49, %v1936_v52  ;;  %v1229_v4 = vsel %vm669_vm5, %v1221_v45, %v1937_v51 }
 0x22f   : > { %v1942_v11 = vunpack.i.h.bf16 %v1940_v42  ;;  %v1941_v9 = vunpack.i.l.bf16 %v1940_v42 }
 0x230   : > { %v1236_v0 = vsel %vm687_vm7, %v1228_v56, %v1976_v63  ;;  %v1237_v26 = vsel %vm687_vm7, %v1229_v4, %v1977_v55 }
 0x231   : > { %v1980_v6 = vpop.permute.xlu0 %1979 }
 0x232   : > { %v2524_v7 = vpop.permute.xlu1 %1944  ;;  %v1982_v38 = vunpack.i.h.bf16 %v1980_v6  ;;  %v1981_v60 = vunpack.i.l.bf16 %v1980_v6 }
 0x233   : > { %v1947_v10 = vunpack.i.h.bf16 %v2524_v7  ;;  %v1946_v33 = vunpack.i.l.bf16 %v2524_v7 }
 0x234   : > { %v1244_v28 = vsel %vm705_vm9, %v1236_v0, %v1981_v60  ;;  %v1245_v46 = vsel %vm705_vm9, %v1237_v26, %v1982_v38 }
 0x235   : > { %v1985_v47 = vpop.permute.xlu0 %1984 }
 0x236   : > { %v2526_v48 = vpop.permute.xlu1 %1949  ;;  %v1987_v61 = vunpack.i.h.bf16 %v1985_v47  ;;  %v1986_v18 = vunpack.i.l.bf16 %v1985_v47 }
 0x237   : > { %v1952_v23 = vunpack.i.h.bf16 %v2526_v48  ;;  %v1951_v36 = vunpack.i.l.bf16 %v2526_v48 }
 0x238   : > { %v1253_v14 = vsel %vm1248_vm10, %v1244_v28, %v1986_v18  ;;  %v1254_v15 = vsel %vm1248_vm10, %v1245_v46, %v1987_v61 }
 0x239   : > { %v1990_v8 = vpop.permute.xlu0 %1989 }
 0x23a   : > { %v1955_v54 = vpop.permute.xlu1 %1954  ;;  %v1992_v41 = vunpack.i.h.bf16 %v1990_v8  ;;  %v1991_v39 = vunpack.i.l.bf16 %v1990_v8 }
 0x23b   : > { %v1957_v37 = vunpack.i.h.bf16 %v1955_v54  ;;  %v1956_v1 = vunpack.i.l.bf16 %v1955_v54 }
 0x23c   : > { %v1262_v58 = vsel %vm1257_vm11, %v1253_v14, %v1991_v39  ;;  %v1263_v59 = vsel %vm1257_vm11, %v1254_v15, %v1992_v41 }
 0x23d   : > { %v1995_v62 = vpop.permute.xlu0 %1994 }
 0x23e   : > { %v1960_v2 = vpop.permute.xlu1 %1959  ;;  %v1997_v35 = vunpack.i.h.bf16 %v1995_v62  ;;  %v1996_v43 = vunpack.i.l.bf16 %v1995_v62 }
 0x23f   : > { %v1962_v3 = vunpack.i.h.bf16 %v1960_v2  ;;  %v1961_v5 = vunpack.i.l.bf16 %v1960_v2 }
 0x240   : > { %v1271_v21 = vsel %vm1266_vm12, %v1262_v58, %v1996_v43  ;;  %v1272_v22 = vsel %vm1266_vm12, %v1263_v59, %v1997_v35 }
 0x241   : > { %v2000_v57 = vpop.permute.xlu0 %1999  ;;  %v1223_v29 = vsel %vm651_vm3, %v2464_v53, %v1962_v3  ;;  %v1222_v30 = vsel %vm651_vm3, %v2458_v50, %v1961_v5  ;;  %vm1427_vm3 = vcmask 122880  }
 0x242   : > { %v2002_v17 = vunpack.i.h.bf16 %v2000_v57  ;;  %v2001_v19 = vunpack.i.l.bf16 %v2000_v57  ;;  %v1965_v20 = vpop.permute.xlu1 %1964 }
 0x243   : > { %v1967_v24 = vunpack.i.h.bf16 %v1965_v20  ;;  %v1966_v27 = vunpack.i.l.bf16 %v1965_v20 }
 0x244   : > { %v1280_v31 = vsel %vm1275_vm13, %v1271_v21, %v2001_v19  ;;  %v1281_v32 = vsel %vm1275_vm13, %v1272_v22, %v2002_v17 }
 0x245   : > { %v1286_v34 = vpack.c.bf16 %v1281_v32, %v1280_v31  ;;  %v1230_v13 = vsel %vm669_vm5, %v1222_v30, %v1966_v27  ;;  %v1231_v16 = vsel %vm669_vm5, %v1223_v29, %v1967_v24 }
 0x246   : > { %v1238_v53 = vsel %vm687_vm7, %v1230_v13, %v1941_v9  ;;  %v1239_v25 = vsel %vm687_vm7, %v1231_v16, %v1942_v11  ;;  %v1970_v50 = vpop.permute.xlu1 %1969 }
 0x247   : > { %v1246_v40 = vsel %vm705_vm9, %v1238_v53, %v1946_v33  ;;  %v1247_v42 = vsel %vm705_vm9, %v1239_v25, %v1947_v10  ;;  %1660 = vmatprep.mubr.msk.bf16.mxu1 %vm1324_vm14, %v1286_v34  ;;  %v1972_v6 = vunpack.i.h.bf16 %v1970_v50  ;;  %v1971_v7 = vunpack.i.l.bf16 %v1970_v50 }
 0x248   : > { %v1255_v12 = vsel %vm1248_vm10, %v1246_v40, %v1951_v36  ;;  %v1256_v44 = vsel %vm1248_vm10, %v1247_v42, %v1952_v23 }
 0x249   : > { %v1264_v47 = vsel %vm1257_vm11, %v1255_v12, %v1956_v1  ;;  %v1265_v48 = vsel %vm1257_vm11, %v1256_v44, %v1957_v37 }
 0x24a   : > { %v2005_v45 = vpop.permute.xlu1 %2004  ;;  %v1273_v51 = vsel %vm1266_vm12, %v1264_v47, %v1971_v7  ;;  %v1274_v52 = vsel %vm1266_vm12, %v1265_v48, %v1972_v6 }
 0x24b   : > { %v2007_v49 = vunpack.i.h.bf16 %v2005_v45  ;;  %v2006_v8 = vunpack.i.l.bf16 %v2005_v45 }
 0x24d   : > { %v1282_v54 = vsel %vm1275_vm13, %v1273_v51, %v2006_v8  ;;  %v1283_v55 = vsel %vm1275_vm13, %v1274_v52, %v2007_v49 }
 0x24e   : > { %v1287_v63 = vpack.c.bf16 %v1283_v55, %v1282_v54 }
 0x250   : > { %1661 = vmatmul.mubr.msk.bf16.gmra.mrb[4].mxu1 %vm1324_vm14, %v1287_v63 }
 0x300   : > { %v1658_v56 = vpop.f32.mrb[0].mxu1 }
 0x301   : > { %1461 = vst.msk [vmem:[%s2578_s10 + $0x10] sm:$0xff] %vm669_vm5, %v1658_v56  ;;  %v1375_v4 = vpop.f32.mrb[1].mxu1  ;;  %v1431_v18 = vmul.f32 %v1658_v56, %v1658_v56  ;;  %v1409_v2 = vsel %vm669_vm5, %v1658_v56, 0.0 }
 0x302   : > { %v1429_v38 = vmul.f32 %v1375_v4, %v1375_v4  ;;  %1459 = vst.msk [vmem:[%s2578_s10] sm:$0xff] %vm669_vm5, %v1375_v4  ;;  %v1659_v60 = vpop.f32.mrb[2].mxu1  ;;  %v1406_v62 = vsel %vm669_vm5, %v1375_v4, 0.0 }
 0x303   : > { %1462 = vst.msk [vmem:[%s2578_s10 + $0x18] sm:$0xff] %vm669_vm5, %v1659_v60  ;;  %v1378_v61 = vpop.f32.mrb[3].mxu1  ;;  %v1432_v26 = vmul.f32 %v1659_v60, %v1659_v60  ;;  %v1440_v46 = vsel %vm669_vm5, %v1431_v18, 0.0  ;;  %v1411_v3 = vsel %vm669_vm5, %v1659_v60, 0.0 }
 0x304   : > { %v1407_v11 = vsel %vm669_vm5, %v1378_v61, 0.0  ;;  %v1430_v41 = vmul.f32 %v1378_v61, %v1378_v61  ;;  %1460 = vst.msk [vmem:[%s2578_s10 + $0x8] sm:$0xff] %vm669_vm5, %v1378_v61  ;;  %v1437_v0 = vsel %vm669_vm5, %v1429_v38, 0.0 }
 0x305   : > { %v1408_v39 = vadd.f32 %v1407_v11, %v1406_v62  ;;  %v1442_v10 = vsel %vm669_vm5, %v1432_v26, 0.0 }
 0x306   : > { %v1438_v35 = vsel %vm669_vm5, %v1430_v41, 0.0 }
 0x307   : > { %v1410_v43 = vadd.f32 %v1409_v2, %v1408_v39  ;;  %v1439_v28 = vadd.f32 %v1438_v35, %v1437_v0 }
 0x309   : > { %v1441_v5 = vadd.f32 %v1440_v46, %v1439_v28  ;;  %v1412_v9 = vadd.f32 %v1411_v3, %v1410_v43 }
 0x30b   : > { %v1443_v14 = vadd.f32 %v1442_v10, %v1441_v5 }
 0x323   : > { %v1662_v15 = vpop.f32.mrb[4].mxu1 }
 0x324   : > { %1465 = vst.msk [vmem:[%s2578_s10 + $0x30] sm:$0xff] %vm669_vm5, %v1662_v15  ;;  %v1391_v57 = vpop.f32.mrb[5].mxu1  ;;  %v1435_v21 = vmul.f32 %v1662_v15, %v1662_v15  ;;  %v1417_v31 = vsel %vm669_vm5, %v1662_v15, 0.0 }
 0x325   : > { %v1413_v58 = vsel %vm669_vm5, %v1391_v57, 0.0  ;;  %v1433_v59 = vmul.f32 %v1391_v57, %v1391_v57  ;;  %1463 = vst.msk [vmem:[%s2578_s10 + $0x20] sm:$0xff] %vm669_vm5, %v1391_v57  ;;  %v1663_v17 = vpop.f32.mrb[6].mxu1 }
 0x326   : > { %v1414_v19 = vadd.f32 %v1413_v58, %v1412_v9  ;;  %1466 = vst.msk [vmem:[%s2578_s10 + $0x38] sm:$0xff] %vm669_vm5, %v1663_v17  ;;  %v1394_v20 = vpop.f32.mrb[7].mxu1  ;;  %v1436_v32 = vmul.f32 %v1663_v17, %v1663_v17  ;;  %v1448_v16 = vsel %vm669_vm5, %v1435_v21, 0.0  ;;  %v1419_v23 = vsel %vm669_vm5, %v1663_v17, 0.0 }
 0x327   : > { %v1444_v22 = vsel %vm669_vm5, %v1433_v59, 0.0  ;;  %v1415_v24 = vsel %vm669_vm5, %v1394_v20, 0.0  ;;  %v1434_v27 = vmul.f32 %v1394_v20, %v1394_v20  ;;  %1464 = vst.msk [vmem:[%s2578_s10 + $0x28] sm:$0xff] %vm669_vm5, %v1394_v20 }
 0x328   : > { %v1445_v29 = vadd.f32 %v1444_v22, %v1443_v14  ;;  %v1416_v30 = vadd.f32 %v1415_v24, %v1414_v19  ;;  %v1450_v25 = vsel %vm669_vm5, %v1436_v32, 0.0 }
 0x329   : > { %v1446_v33 = vsel %vm669_vm5, %v1434_v27, 0.0 }
 0x32a   : > { %v1418_v34 = vadd.f32 %v1417_v31, %v1416_v30  ;;  %v1447_v13 = vadd.f32 %v1446_v33, %v1445_v29 }
 0x32c   : > { %v1420_v36 = vadd.f32 %v1419_v23, %v1418_v34  ;;  %v1449_v53 = vadd.f32 %v1448_v16, %v1447_v13 }
 0x32e   : > { %v1421_v50 = vrot.slane %v1420_v36, 4  ;;  %v1451_v37 = vadd.f32 %v1450_v25, %v1449_v53 }
 0x330   : > { %v1422_v1 = vadd.f32 %v1421_v50, %v1420_v36  ;;  %v1452_v40 = vrot.slane %v1451_v37, 4 }
 0x332   : > { %v1423_v42 = vrot.slane %v1422_v1, 2  ;;  %v1453_v6 = vadd.f32 %v1452_v40, %v1451_v37 }
 0x334   : > { %v1424_v7 = vadd.f32 %v1423_v42, %v1422_v1  ;;  %v1454_v12 = vrot.slane %v1453_v6, 2 }
 0x336   : > { %v1425_v44 = vrot.slane %v1424_v7, 1  ;;  %v1455_v47 = vadd.f32 %v1454_v12, %v1453_v6 }
 0x338   : > { %v1426_v48 = vadd.f32 %v1425_v44, %v1424_v7  ;;  %v1456_v45 = vrot.slane %v1455_v47, 1 }
 0x33a   : > { %1428 = vst.msk [vmem:[%s240_s14] sm:$0x1] %vm1427_vm3, %v1426_v48  ;;  %v1457_v49 = vadd.f32 %v1456_v45, %v1455_v47 }
 0x33c   : > { %1458 = vst.msk [vmem:[%s240_s14 + $0x1] sm:$0x1] %vm1427_vm3, %v1457_v49 }
 0x33d PF: > { %s16_s18 = sadd.s32 1, %s2022_s18  }
 0x33e   : > { %p13_p5 = scmp.ge.s32.totalorder %s16_s18, 4  }
 0x340   :  { %15 = sbr.rel (!%p13_p5) target bundleno = 1 (0x1), region = 84 }

</bundles_post_ra>
